<compile_context>
chip_gen: v7x
topology: tpu7x:2x2x1
jax: 0.10.0
libtpu: 0.0.40
codegen_flags: <defaults>
</compile_context>

<pallas_src>
import jax
import jax.numpy as jnp
from jax.experimental import pallas as pl
from jax.experimental.pallas import tpu as pltpu

# ---------------- small BERT-like config ----------------
VOCAB = 100
HIDDEN = 32
N_HEADS = 4
HEAD_DIM = HIDDEN // N_HEADS
N_LAYERS = 2
INTERMEDIATE = 64
MAX_POS = 16
NUM_CLASSES = 3
EPS = 1e-12

BATCH = 2
SEQ = 8

# Lane-aligned slot layout for the fused QKV projection: each (q|k|v, head)
# pair owns a 128-lane slot, so every head slice in the kernel starts at a
# vreg boundary (free select, no cross-lane shift).  The padding columns are
# zero and never read; extra MXU columns are irrelevant at these shapes.
QKV_SLOT = 128
N_QKV_SLOTS = 3 * N_HEADS
QKV_WIDTH = N_QKV_SLOTS * QKV_SLOT


def _slot(kind, head):
    """kind: 0=q, 1=k, 2=v."""
    return kind * N_HEADS + head


# ---------------- in-kernel helpers (operate on VMEM-resident values) -------
def _layernorm(x, gamma, beta):
    """Row-wise LayerNorm over last dim. x:[M,H] f32, gamma/beta:[1,H]."""
    mean = jnp.mean(x, axis=-1, keepdims=True)
    var = jnp.mean(jnp.square(x - mean), axis=-1, keepdims=True)
    inv = jax.lax.rsqrt(var + EPS)
    return (x - mean) * inv * gamma + beta


def _gelu_exact(x):
    # HF bert-base uses exact (erf) GELU.  lax.erf is a VALU polynomial; a
    # tanh-approx GELU would ride the otherwise-idle EUP slot but changes
    # numerics, so the exact form is kept to preserve PyTorch/HF semantics.
    return 0.5 * x * (1.0 + jax.lax.erf(x * (1.0 / jnp.sqrt(jnp.float32(2.0)))))


def _attention(qkv):
    """Multi-head self-attention for one sequence.

    qkv: [S, QKV_WIDTH] f32 (lane-slot layout) -> context [S, HIDDEN] f32.
    No attention mask: the PyTorch module calls self.bert(x) without an
    attention_mask, which defaults to all-ones (attend to every position).
    """
    def heads(kind):
        # Aligned lane slices (free vreg selects) + leading-axis concat.
        parts = []
        for hd in range(N_HEADS):
            c0 = _slot(kind, hd) * QKV_SLOT
            parts.append(qkv[:, c0:c0 + HEAD_DIM][None])      # [1, S, HD]
        return jnp.concatenate(parts, axis=0)                 # [NH, S, HD]

    q = heads(0)
    k = heads(1)
    v = heads(2)

    scale = jnp.float32(1.0) / jnp.sqrt(jnp.float32(HEAD_DIM))
    # Single batched score einsum over the head axis (contract last dims; no
    # explicit k transpose materialization).
    s = jnp.einsum('hqd,hkd->hqk', q, k,
                   preferred_element_type=jnp.float32) * scale   # [NH, S, S]
    m = jnp.max(s, axis=-1, keepdims=True)
    p = jnp.exp(s - m)
    denom = jnp.sum(p, axis=-1, keepdims=True)
    # approx reciprocal rides the EUP slot; tiny deviation from exact divide.
    p = p * pl.reciprocal(denom, approx=True)
    ctx = jnp.einsum('hqk,hkd->hqd', p, v,
                     preferred_element_type=jnp.float32)          # [NH, S, HD]
    # Merge heads back to [S, HIDDEN] with one lane concat.
    return jnp.concatenate([ctx[hd] for hd in range(N_HEADS)], axis=-1)


def _transformer_layer(h, wqkv, bqkv, wo, bo, ln1_g, ln1_b,
                       w1, b1, w2, b2, ln2_g, ln2_b):
    """One BERT encoder layer for one sequence. h: [S, H] f32."""
    # Fused QKV projection (single matmul into the lane-slot layout).
    qkv = jnp.dot(h, wqkv, preferred_element_type=jnp.float32) + bqkv
    ctx = _attention(qkv)

    # Output projection + residual + LayerNorm epilogue.
    attn_out = jnp.dot(ctx, wo, preferred_element_type=jnp.float32) + bo
    h = _layernorm(h + attn_out, ln1_g, ln1_b)

    # Feed-forward: matmul + GELU + matmul + residual + LayerNorm.
    inter = _gelu_exact(jnp.dot(h, w1, preferred_element_type=jnp.float32) + b1)
    ffn_out = jnp.dot(inter, w2, preferred_element_type=jnp.float32) + b2
    h = _layernorm(h + ffn_out, ln2_g, ln2_b)
    return h


# ---------------- fused whole-forward Pallas kernel ----------------
def _bert_forward_kernel(h0_ref, emb_g_ref, emb_b_ref,
                         wqkv_ref, bqkv_ref, wo_ref, bo_ref,
                         ln1_g_ref, ln1_b_ref, w1_ref, b1_ref,
                         w2_ref, b2_ref, ln2_g_ref, ln2_b_ref,
                         pool_w_ref, pool_b_ref, fc_w_ref, fc_b_ref,
                         logits_ref):
    # One grid step == one sequence (grid axis marked "parallel").
    # Embedding LayerNorm (the token-id gather itself is done in the wrapper).
    h = _layernorm(h0_ref[0].astype(jnp.float32),
                   emb_g_ref[...], emb_b_ref[...])                 # [S, H]

    # Encoder layers (static unroll; per-layer weights indexed statically).
    for l in range(N_LAYERS):
        h = _transformer_layer(
            h,
            wqkv_ref[l], bqkv_ref[l], wo_ref[l], bo_ref[l],
            ln1_g_ref[l], ln1_b_ref[l],
            w1_ref[l], b1_ref[l], w2_ref[l], b2_ref[l],
            ln2_g_ref[l], ln2_b_ref[l])

    # Pooler: tanh(Linear(CLS hidden state)); CLS is row 0 of this sequence.
    cls = h[0:1, :]                                                # [1, H]
    pooled = jnp.tanh(
        jnp.dot(cls, pool_w_ref[...], preferred_element_type=jnp.float32)
        + pool_b_ref[...])                                         # [1, H]

    # Classification head (self.fc).  NUM_CLASSES=3 -> masked partial store;
    # negligible at this size (pad toward 128 lanes only if classes grow).
    logits = (jnp.dot(pooled, fc_w_ref[...], preferred_element_type=jnp.float32)
              + fc_b_ref[...])                                     # [1, NC]
    logits_ref[0] = logits.astype(logits_ref.dtype)


def bert_classifier_forward(params, token_ids):
    """token_ids: int32 [B, S] -> logits float32 [B, NUM_CLASSES]"""
    B, S = token_ids.shape

    # Data-dependent embedding gather stays in XLA; everything after it runs
    # inside ONE Pallas kernel.
    word = jnp.take(params["word_emb"], token_ids, axis=0)          # [B, S, H]
    pos = params["pos_emb"][:S][None, :, :]                         # [1, S, H]
    typ = params["type_emb"][0][None, None, :]                      # [1, 1, H]
    h0 = word + pos + typ                                           # [B, S, H]

    args = (
        h0,
        params["emb_ln_g"], params["emb_ln_b"],
        params["wqkv"], params["bqkv"], params["wo"], params["bo"],
        params["ln1_g"], params["ln1_b"], params["w1"], params["b1"],
        params["w2"], params["b2"], params["ln2_g"], params["ln2_b"],
        params["pool_w"], params["pool_b"], params["fc_w"], params["fc_b"],
    )

    def full(shape):
        # Whole-array block, constant index map: weights stay VMEM-resident
        # across grid steps (block index never changes -> no re-DMA).
        nd = len(shape)
        return pl.BlockSpec(shape, lambda b, _nd=nd: (0,) * _nd)

    in_specs = [
        pl.BlockSpec((1, S, HIDDEN), lambda b: (b, 0, 0)),          # h0
        full((1, HIDDEN)), full((1, HIDDEN)),                       # emb LN
        full((N_LAYERS, HIDDEN, QKV_WIDTH)),                        # wqkv
        full((N_LAYERS, 1, QKV_WIDTH)),                             # bqkv
        full((N_LAYERS, HIDDEN, HIDDEN)),                           # wo
        full((N_LAYERS, 1, HIDDEN)),                                # bo
        full((N_LAYERS, 1, HIDDEN)), full((N_LAYERS, 1, HIDDEN)),   # ln1 g/b
        full((N_LAYERS, HIDDEN, INTERMEDIATE)),                     # w1
        full((N_LAYERS, 1, INTERMEDIATE)),                          # b1
        full((N_LAYERS, INTERMEDIATE, HIDDEN)),                     # w2
        full((N_LAYERS, 1, HIDDEN)),                                # b2
        full((N_LAYERS, 1, HIDDEN)), full((N_LAYERS, 1, HIDDEN)),   # ln2 g/b
        full((HIDDEN, HIDDEN)), full((1, HIDDEN)),                  # pooler
        full((HIDDEN, NUM_CLASSES)), full((1, NUM_CLASSES)),        # fc head
    ]

    out = pl.pallas_call(
        _bert_forward_kernel,
        out_shape=jax.ShapeDtypeStruct((B, 1, NUM_CLASSES), jnp.float32),
        grid=(B,),
        in_specs=in_specs,
        out_specs=pl.BlockSpec((1, 1, NUM_CLASSES), lambda b: (b, 0, 0)),
        compiler_params=pltpu.CompilerParams(
            dimension_semantics=("parallel",),        # shard batch across TCs
            vmem_limit_bytes=32 * 1024 * 1024),       # explicit (usage ~1 MiB)
    )(*args)
    return out.reshape(B, NUM_CLASSES)


# ---------------- deterministic parameter init (stacked per-layer) ----------
# TODO(synk): pretrained `bert-base-cased` weights cannot be loaded in-script;
# weights are deterministic synthetic initializations with the same structure.
# (HF/PyTorch Linear weights are [out,in]; this kernel uses x @ W with
#  W:[in,out], so real weights would need a transpose when loading.)
def init_params(key):
    def dense(k, fan_in, fan_out):
        w = jax.random.normal(k, (fan_in, fan_out), jnp.float32) * 0.02
        b = jnp.zeros((1, fan_out), jnp.float32)
        return w, b

    def pack_qkv(wq, wk, wv, bq, bk, bv):
        # Place each (q|k|v, head) [H, HEAD_DIM] block into its own 128-lane
        # slot of the fused weight (init-time only).
        w = jnp.zeros((HIDDEN, QKV_WIDTH), jnp.float32)
        b = jnp.zeros((1, QKV_WIDTH), jnp.float32)
        for kind, (wx, bx) in enumerate(((wq, bq), (wk, bk), (wv, bv))):
            for hd in range(N_HEADS):
                c0 = _slot(kind, hd) * QKV_SLOT
                src = slice(hd * HEAD_DIM, (hd + 1) * HEAD_DIM)
                w = w.at[:, c0:c0 + HEAD_DIM].set(wx[:, src])
                b = b.at[:, c0:c0 + HEAD_DIM].set(bx[:, src])
        return w, b

    keys = iter(jax.random.split(key, 64))
    p = {}
    p["word_emb"] = jax.random.normal(next(keys), (VOCAB, HIDDEN), jnp.float32) * 0.02
    p["pos_emb"] = jax.random.normal(next(keys), (MAX_POS, HIDDEN), jnp.float32) * 0.02
    p["type_emb"] = jax.random.normal(next(keys), (2, HIDDEN), jnp.float32) * 0.02
    p["emb_ln_g"] = jnp.ones((1, HIDDEN), jnp.float32)
    p["emb_ln_b"] = jnp.zeros((1, HIDDEN), jnp.float32)

    wqkv, bqkv, wo, bo = [], [], [], []
    ln1_g, ln1_b, w1, b1, w2, b2, ln2_g, ln2_b = [], [], [], [], [], [], [], []
    for _ in range(N_LAYERS):
        wq, bq = dense(next(keys), HIDDEN, HIDDEN)
        wk, bk = dense(next(keys), HIDDEN, HIDDEN)
        wv, bv = dense(next(keys), HIDDEN, HIDDEN)
        w, b = pack_qkv(wq, wk, wv, bq, bk, bv)
        wqkv.append(w); bqkv.append(b)
        w, b = dense(next(keys), HIDDEN, HIDDEN)
        wo.append(w); bo.append(b)
        ln1_g.append(jnp.ones((1, HIDDEN), jnp.float32))
        ln1_b.append(jnp.zeros((1, HIDDEN), jnp.float32))
        w, b = dense(next(keys), HIDDEN, INTERMEDIATE)
        w1.append(w); b1.append(b)
        w, b = dense(next(keys), INTERMEDIATE, HIDDEN)
        w2.append(w); b2.append(b)
        ln2_g.append(jnp.ones((1, HIDDEN), jnp.float32))
        ln2_b.append(jnp.zeros((1, HIDDEN), jnp.float32))

    stack = lambda xs: jnp.stack(xs, axis=0)
    p["wqkv"], p["bqkv"] = stack(wqkv), stack(bqkv)
    p["wo"], p["bo"] = stack(wo), stack(bo)
    p["ln1_g"], p["ln1_b"] = stack(ln1_g), stack(ln1_b)
    p["w1"], p["b1"] = stack(w1), stack(b1)
    p["w2"], p["b2"] = stack(w2), stack(b2)
    p["ln2_g"], p["ln2_b"] = stack(ln2_g), stack(ln2_b)

    p["pool_w"], p["pool_b"] = dense(next(keys), HIDDEN, HIDDEN)
    p["fc_w"], p["fc_b"] = dense(next(keys), HIDDEN, NUM_CLASSES)
    return p


if __name__ == "__main__":
    key = jax.random.PRNGKey(0)
    k_params, k_tokens = jax.random.split(key)
    params = init_params(k_params)
    token_ids = jax.random.randint(k_tokens, (BATCH, SEQ), 0, VOCAB, dtype=jnp.int32)

    logits = jax.jit(bert_classifier_forward)(params, token_ids)
    jax.block_until_ready(logits)
    assert logits.shape == (BATCH, NUM_CLASSES)
    assert logits.dtype == jnp.float32
    print("KERNEL_OK")
</pallas_src>

<mosaic_0001>
module attributes {stable_mosaic.version = 11 : i64} {
  func.func @_bert_forward_kernel(%arg0: i32, %arg1: memref<1x8x32xf32, #tpu.memory_space<vmem>>, %arg2: memref<1x32xf32, #tpu.memory_space<vmem>>, %arg3: memref<1x32xf32, #tpu.memory_space<vmem>>, %arg4: memref<2x32x1536xf32, #tpu.memory_space<vmem>>, %arg5: memref<2x1x1536xf32, #tpu.memory_space<vmem>>, %arg6: memref<2x32x32xf32, #tpu.memory_space<vmem>>, %arg7: memref<2x1x32xf32, #tpu.memory_space<vmem>>, %arg8: memref<2x1x32xf32, #tpu.memory_space<vmem>>, %arg9: memref<2x1x32xf32, #tpu.memory_space<vmem>>, %arg10: memref<2x32x64xf32, #tpu.memory_space<vmem>>, %arg11: memref<2x1x64xf32, #tpu.memory_space<vmem>>, %arg12: memref<2x64x32xf32, #tpu.memory_space<vmem>>, %arg13: memref<2x1x32xf32, #tpu.memory_space<vmem>>, %arg14: memref<2x1x32xf32, #tpu.memory_space<vmem>>, %arg15: memref<2x1x32xf32, #tpu.memory_space<vmem>>, %arg16: memref<32x32xf32, #tpu.memory_space<vmem>>, %arg17: memref<1x32xf32, #tpu.memory_space<vmem>>, %arg18: memref<32x3xf32, #tpu.memory_space<vmem>>, %arg19: memref<1x3xf32, #tpu.memory_space<vmem>>, %arg20: memref<1x1x3xf32, #tpu.memory_space<vmem>>) attributes {dimension_semantics = [#tpu.dimension_semantics<parallel>], iteration_bounds = array<i64: 2>, scalar_prefetch = 0 : i64, scratch_operands = 0 : i64, tpu.core_type = #tpu.core_type<tc>, window_params = [{transform_indices = @transform_0, window_bounds = array<i64: 1, 8, 32>}, {pipeline_mode = #tpu.pipeline_mode<synchronous>, transform_indices = @transform_1, window_bounds = array<i64: 1, 32>}, {pipeline_mode = #tpu.pipeline_mode<synchronous>, transform_indices = @transform_2, window_bounds = array<i64: 1, 32>}, {pipeline_mode = #tpu.pipeline_mode<synchronous>, transform_indices = @transform_3, window_bounds = array<i64: 2, 32, 1536>}, {pipeline_mode = #tpu.pipeline_mode<synchronous>, transform_indices = @transform_4, window_bounds = array<i64: 2, 1, 1536>}, {pipeline_mode = #tpu.pipeline_mode<synchronous>, transform_indices = @transform_5, window_bounds = array<i64: 2, 32, 32>}, {pipeline_mode = #tpu.pipeline_mode<synchronous>, transform_indices = @transform_6, window_bounds = array<i64: 2, 1, 32>}, {pipeline_mode = #tpu.pipeline_mode<synchronous>, transform_indices = @transform_7, window_bounds = array<i64: 2, 1, 32>}, {pipeline_mode = #tpu.pipeline_mode<synchronous>, transform_indices = @transform_8, window_bounds = array<i64: 2, 1, 32>}, {pipeline_mode = #tpu.pipeline_mode<synchronous>, transform_indices = @transform_9, window_bounds = array<i64: 2, 32, 64>}, {pipeline_mode = #tpu.pipeline_mode<synchronous>, transform_indices = @transform_10, window_bounds = array<i64: 2, 1, 64>}, {pipeline_mode = #tpu.pipeline_mode<synchronous>, transform_indices = @transform_11, window_bounds = array<i64: 2, 64, 32>}, {pipeline_mode = #tpu.pipeline_mode<synchronous>, transform_indices = @transform_12, window_bounds = array<i64: 2, 1, 32>}, {pipeline_mode = #tpu.pipeline_mode<synchronous>, transform_indices = @transform_13, window_bounds = array<i64: 2, 1, 32>}, {pipeline_mode = #tpu.pipeline_mode<synchronous>, transform_indices = @transform_14, window_bounds = array<i64: 2, 1, 32>}, {pipeline_mode = #tpu.pipeline_mode<synchronous>, transform_indices = @transform_15, window_bounds = array<i64: 32, 32>}, {pipeline_mode = #tpu.pipeline_mode<synchronous>, transform_indices = @transform_16, window_bounds = array<i64: 1, 32>}, {pipeline_mode = #tpu.pipeline_mode<synchronous>, transform_indices = @transform_17, window_bounds = array<i64: 32, 3>}, {pipeline_mode = #tpu.pipeline_mode<synchronous>, transform_indices = @transform_18, window_bounds = array<i64: 1, 3>}, {transform_indices = @transform_19, window_bounds = array<i64: 1, 1, 3>}]} {
    %c0 = arith.constant 0 : index
    %c0_0 = arith.constant 0 : index
    %c0_1 = arith.constant 0 : index
    %0 = vector.load %arg1[%c0, %c0_0, %c0_1] : memref<1x8x32xf32, #tpu.memory_space<vmem>>, vector<1x8x32xf32>
    %1 = vector.shape_cast %0 : vector<1x8x32xf32> to vector<8x32xf32>
    %c0_2 = arith.constant 0 : index
    %c0_3 = arith.constant 0 : index
    %2 = vector.load %arg2[%c0_2, %c0_3] : memref<1x32xf32, #tpu.memory_space<vmem>>, vector<1x32xf32>
    %c0_4 = arith.constant 0 : index
    %c0_5 = arith.constant 0 : index
    %3 = vector.load %arg3[%c0_4, %c0_5] : memref<1x32xf32, #tpu.memory_space<vmem>>, vector<1x32xf32>
    %cst = arith.constant dense<0.000000e+00> : vector<8xf32>
    %4 = vector.multi_reduction <add>, %1, %cst [1] : vector<8x32xf32> to vector<8xf32>
    %5 = vector.shape_cast %4 : vector<8xf32> to vector<8x1xf32>
    %cst_6 = arith.constant 3.200000e+01 : f32
    %6 = vector.broadcast %cst_6 : f32 to vector<8x1xf32>
    %7 = arith.divf %5, %6 : vector<8x1xf32>
    %8 = vector.broadcast %7 : vector<8x1xf32> to vector<8x32xf32>
    %9 = arith.subf %1, %8 : vector<8x32xf32>
    %10 = arith.mulf %9, %9 : vector<8x32xf32>
    %cst_7 = arith.constant dense<0.000000e+00> : vector<8xf32>
    %11 = vector.multi_reduction <add>, %10, %cst_7 [1] : vector<8x32xf32> to vector<8xf32>
    %12 = vector.shape_cast %11 : vector<8xf32> to vector<8x1xf32>
    %cst_8 = arith.constant 3.200000e+01 : f32
    %13 = vector.broadcast %cst_8 : f32 to vector<8x1xf32>
    %14 = arith.divf %12, %13 : vector<8x1xf32>
    %cst_9 = arith.constant 9.99999996E-13 : f32
    %15 = vector.broadcast %cst_9 : f32 to vector<8x1xf32>
    %16 = arith.addf %14, %15 : vector<8x1xf32>
    %17 = math.rsqrt %16 : vector<8x1xf32>
    %18 = vector.broadcast %7 : vector<8x1xf32> to vector<8x32xf32>
    %19 = arith.subf %1, %18 : vector<8x32xf32>
    %20 = vector.broadcast %17 : vector<8x1xf32> to vector<8x32xf32>
    %21 = arith.mulf %19, %20 : vector<8x32xf32>
    %22 = vector.broadcast %2 : vector<1x32xf32> to vector<8x32xf32>
    %23 = arith.mulf %21, %22 : vector<8x32xf32>
    %24 = vector.broadcast %3 : vector<1x32xf32> to vector<8x32xf32>
    %25 = arith.addf %23, %24 : vector<8x32xf32>
    %c0_10 = arith.constant 0 : index
    %c0_11 = arith.constant 0 : index
    %c0_12 = arith.constant 0 : index
    %26 = vector.load %arg4[%c0_10, %c0_11, %c0_12] : memref<2x32x1536xf32, #tpu.memory_space<vmem>>, vector<1x32x1536xf32>
    %27 = vector.shape_cast %26 : vector<1x32x1536xf32> to vector<32x1536xf32>
    %c0_13 = arith.constant 0 : index
    %c0_14 = arith.constant 0 : index
    %c0_15 = arith.constant 0 : index
    %28 = vector.load %arg5[%c0_13, %c0_14, %c0_15] : memref<2x1x1536xf32, #tpu.memory_space<vmem>>, vector<1x1x1536xf32>
    %29 = vector.shape_cast %28 : vector<1x1x1536xf32> to vector<1x1536xf32>
    %c0_16 = arith.constant 0 : index
    %c0_17 = arith.constant 0 : index
    %c0_18 = arith.constant 0 : index
    %30 = vector.load %arg6[%c0_16, %c0_17, %c0_18] : memref<2x32x32xf32, #tpu.memory_space<vmem>>, vector<1x32x32xf32>
    %31 = vector.shape_cast %30 : vector<1x32x32xf32> to vector<32x32xf32>
    %c0_19 = arith.constant 0 : index
    %c0_20 = arith.constant 0 : index
    %c0_21 = arith.constant 0 : index
    %32 = vector.load %arg7[%c0_19, %c0_20, %c0_21] : memref<2x1x32xf32, #tpu.memory_space<vmem>>, vector<1x1x32xf32>
    %33 = vector.shape_cast %32 : vector<1x1x32xf32> to vector<1x32xf32>
    %c0_22 = arith.constant 0 : index
    %c0_23 = arith.constant 0 : index
    %c0_24 = arith.constant 0 : index
    %34 = vector.load %arg8[%c0_22, %c0_23, %c0_24] : memref<2x1x32xf32, #tpu.memory_space<vmem>>, vector<1x1x32xf32>
    %35 = vector.shape_cast %34 : vector<1x1x32xf32> to vector<1x32xf32>
    %c0_25 = arith.constant 0 : index
    %c0_26 = arith.constant 0 : index
    %c0_27 = arith.constant 0 : index
    %36 = vector.load %arg9[%c0_25, %c0_26, %c0_27] : memref<2x1x32xf32, #tpu.memory_space<vmem>>, vector<1x1x32xf32>
    %37 = vector.shape_cast %36 : vector<1x1x32xf32> to vector<1x32xf32>
    %c0_28 = arith.constant 0 : index
    %c0_29 = arith.constant 0 : index
    %c0_30 = arith.constant 0 : index
    %38 = vector.load %arg10[%c0_28, %c0_29, %c0_30] : memref<2x32x64xf32, #tpu.memory_space<vmem>>, vector<1x32x64xf32>
    %39 = vector.shape_cast %38 : vector<1x32x64xf32> to vector<32x64xf32>
    %c0_31 = arith.constant 0 : index
    %c0_32 = arith.constant 0 : index
    %c0_33 = arith.constant 0 : index
    %40 = vector.load %arg11[%c0_31, %c0_32, %c0_33] : memref<2x1x64xf32, #tpu.memory_space<vmem>>, vector<1x1x64xf32>
    %41 = vector.shape_cast %40 : vector<1x1x64xf32> to vector<1x64xf32>
    %c0_34 = arith.constant 0 : index
    %c0_35 = arith.constant 0 : index
    %c0_36 = arith.constant 0 : index
    %42 = vector.load %arg12[%c0_34, %c0_35, %c0_36] : memref<2x64x32xf32, #tpu.memory_space<vmem>>, vector<1x64x32xf32>
    %43 = vector.shape_cast %42 : vector<1x64x32xf32> to vector<64x32xf32>
    %c0_37 = arith.constant 0 : index
    %c0_38 = arith.constant 0 : index
    %c0_39 = arith.constant 0 : index
    %44 = vector.load %arg13[%c0_37, %c0_38, %c0_39] : memref<2x1x32xf32, #tpu.memory_space<vmem>>, vector<1x1x32xf32>
    %45 = vector.shape_cast %44 : vector<1x1x32xf32> to vector<1x32xf32>
    %c0_40 = arith.constant 0 : index
    %c0_41 = arith.constant 0 : index
    %c0_42 = arith.constant 0 : index
    %46 = vector.load %arg14[%c0_40, %c0_41, %c0_42] : memref<2x1x32xf32, #tpu.memory_space<vmem>>, vector<1x1x32xf32>
    %47 = vector.shape_cast %46 : vector<1x1x32xf32> to vector<1x32xf32>
    %c0_43 = arith.constant 0 : index
    %c0_44 = arith.constant 0 : index
    %c0_45 = arith.constant 0 : index
    %48 = vector.load %arg15[%c0_43, %c0_44, %c0_45] : memref<2x1x32xf32, #tpu.memory_space<vmem>>, vector<1x1x32xf32>
    %49 = vector.shape_cast %48 : vector<1x1x32xf32> to vector<1x32xf32>
    %cst_46 = arith.constant dense<0.000000e+00> : vector<8x1536xf32>
    %50 = tpu.matmul %25, %27, %cst_46 {dimension_numbers = #tpu.dot_dimension_numbers<[1], [0], [0], [1], [0, 0, 1, 1], [], []>} : vector<8x32xf32>, vector<32x1536xf32>, vector<8x1536xf32> -> vector<8x1536xf32>
    %51 = vector.broadcast %29 : vector<1x1536xf32> to vector<8x1536xf32>
    %52 = arith.addf %50, %51 : vector<8x1536xf32>
    %53 = vector.extract_strided_slice %52 {offsets = [0, 0], sizes = [8, 8], strides = [1, 1]} : vector<8x1536xf32> to vector<8x8xf32>
    %54 = vector.shape_cast %53 : vector<8x8xf32> to vector<1x8x8xf32>
    %55 = vector.extract_strided_slice %52 {offsets = [0, 128], sizes = [8, 8], strides = [1, 1]} : vector<8x1536xf32> to vector<8x8xf32>
    %56 = vector.shape_cast %55 : vector<8x8xf32> to vector<1x8x8xf32>
    %57 = vector.extract_strided_slice %52 {offsets = [0, 256], sizes = [8, 8], strides = [1, 1]} : vector<8x1536xf32> to vector<8x8xf32>
    %58 = vector.shape_cast %57 : vector<8x8xf32> to vector<1x8x8xf32>
    %59 = vector.extract_strided_slice %52 {offsets = [0, 384], sizes = [8, 8], strides = [1, 1]} : vector<8x1536xf32> to vector<8x8xf32>
    %60 = vector.shape_cast %59 : vector<8x8xf32> to vector<1x8x8xf32>
    %61 = tpu.concatenate %54, %56, %58, %60 in 0 : vector<1x8x8xf32>, vector<1x8x8xf32>, vector<1x8x8xf32>, vector<1x8x8xf32> -> vector<4x8x8xf32>
    %62 = vector.extract_strided_slice %52 {offsets = [0, 512], sizes = [8, 8], strides = [1, 1]} : vector<8x1536xf32> to vector<8x8xf32>
    %63 = vector.shape_cast %62 : vector<8x8xf32> to vector<1x8x8xf32>
    %64 = vector.extract_strided_slice %52 {offsets = [0, 640], sizes = [8, 8], strides = [1, 1]} : vector<8x1536xf32> to vector<8x8xf32>
    %65 = vector.shape_cast %64 : vector<8x8xf32> to vector<1x8x8xf32>
    %66 = vector.extract_strided_slice %52 {offsets = [0, 768], sizes = [8, 8], strides = [1, 1]} : vector<8x1536xf32> to vector<8x8xf32>
    %67 = vector.shape_cast %66 : vector<8x8xf32> to vector<1x8x8xf32>
    %68 = vector.extract_strided_slice %52 {offsets = [0, 896], sizes = [8, 8], strides = [1, 1]} : vector<8x1536xf32> to vector<8x8xf32>
    %69 = vector.shape_cast %68 : vector<8x8xf32> to vector<1x8x8xf32>
    %70 = tpu.concatenate %63, %65, %67, %69 in 0 : vector<1x8x8xf32>, vector<1x8x8xf32>, vector<1x8x8xf32>, vector<1x8x8xf32> -> vector<4x8x8xf32>
    %71 = vector.extract_strided_slice %52 {offsets = [0, 1024], sizes = [8, 8], strides = [1, 1]} : vector<8x1536xf32> to vector<8x8xf32>
    %72 = vector.shape_cast %71 : vector<8x8xf32> to vector<1x8x8xf32>
    %73 = vector.extract_strided_slice %52 {offsets = [0, 1152], sizes = [8, 8], strides = [1, 1]} : vector<8x1536xf32> to vector<8x8xf32>
    %74 = vector.shape_cast %73 : vector<8x8xf32> to vector<1x8x8xf32>
    %75 = vector.extract_strided_slice %52 {offsets = [0, 1280], sizes = [8, 8], strides = [1, 1]} : vector<8x1536xf32> to vector<8x8xf32>
    %76 = vector.shape_cast %75 : vector<8x8xf32> to vector<1x8x8xf32>
    %77 = vector.extract_strided_slice %52 {offsets = [0, 1408], sizes = [8, 8], strides = [1, 1]} : vector<8x1536xf32> to vector<8x8xf32>
    %78 = vector.shape_cast %77 : vector<8x8xf32> to vector<1x8x8xf32>
    %79 = tpu.concatenate %72, %74, %76, %78 in 0 : vector<1x8x8xf32>, vector<1x8x8xf32>, vector<1x8x8xf32>, vector<1x8x8xf32> -> vector<4x8x8xf32>
    %cst_47 = arith.constant 8.000000e+00 : f32
    %80 = math.sqrt %cst_47 : f32
    %cst_48 = arith.constant 1.000000e+00 : f32
    %81 = arith.divf %cst_48, %80 : f32
    "tpu.trace_start"() <{level = 10 : i32, message = "hqd,hkd->hqk"}> : () -> ()
    %cst_49 = arith.constant dense<0.000000e+00> : vector<4x8x8xf32>
    %82 = tpu.matmul %61, %70, %cst_49 {dimension_numbers = #tpu.dot_dimension_numbers<[2], [2], [1], [1], [0, 0, 0, 1, 1, 1], [0], [0]>} : vector<4x8x8xf32>, vector<4x8x8xf32>, vector<4x8x8xf32> -> vector<4x8x8xf32>
    "tpu.trace_stop"() : () -> ()
    %83 = vector.broadcast %81 : f32 to vector<4x8x8xf32>
    %84 = arith.mulf %82, %83 : vector<4x8x8xf32>
    %cst_50 = arith.constant dense<0xFF800000> : vector<4x8xf32>
    %85 = vector.multi_reduction <maximumf>, %84, %cst_50 [2] : vector<4x8x8xf32> to vector<4x8xf32>
    %86 = vector.shape_cast %85 : vector<4x8xf32> to vector<4x8x1xf32>
    %87 = vector.broadcast %86 : vector<4x8x1xf32> to vector<4x8x8xf32>
    %88 = arith.subf %84, %87 : vector<4x8x8xf32>
    %89 = math.exp %88 : vector<4x8x8xf32>
    %cst_51 = arith.constant dense<0.000000e+00> : vector<4x8xf32>
    %90 = vector.multi_reduction <add>, %89, %cst_51 [2] : vector<4x8x8xf32> to vector<4x8xf32>
    %91 = vector.shape_cast %90 : vector<4x8xf32> to vector<4x8x1xf32>
    %92 = tpu.reciprocal %91 {approx = true} : vector<4x8x1xf32> -> vector<4x8x1xf32>
    %93 = vector.broadcast %92 : vector<4x8x1xf32> to vector<4x8x8xf32>
    %94 = arith.mulf %89, %93 : vector<4x8x8xf32>
    "tpu.trace_start"() <{level = 10 : i32, message = "hqk,hkd->hqd"}> : () -> ()
    %cst_52 = arith.constant dense<0.000000e+00> : vector<4x8x8xf32>
    %95 = tpu.matmul %94, %79, %cst_52 {dimension_numbers = #tpu.dot_dimension_numbers<[2], [1], [1], [2], [0, 0, 0, 1, 1, 2], [0], [0]>} : vector<4x8x8xf32>, vector<4x8x8xf32>, vector<4x8x8xf32> -> vector<4x8x8xf32>
    "tpu.trace_stop"() : () -> ()
    %96 = vector.extract_strided_slice %95 {offsets = [0, 0, 0], sizes = [1, 8, 8], strides = [1, 1, 1]} : vector<4x8x8xf32> to vector<1x8x8xf32>
    %97 = vector.shape_cast %96 : vector<1x8x8xf32> to vector<8x8xf32>
    %98 = vector.extract_strided_slice %95 {offsets = [1, 0, 0], sizes = [1, 8, 8], strides = [1, 1, 1]} : vector<4x8x8xf32> to vector<1x8x8xf32>
    %99 = vector.shape_cast %98 : vector<1x8x8xf32> to vector<8x8xf32>
    %100 = vector.extract_strided_slice %95 {offsets = [2, 0, 0], sizes = [1, 8, 8], strides = [1, 1, 1]} : vector<4x8x8xf32> to vector<1x8x8xf32>
    %101 = vector.shape_cast %100 : vector<1x8x8xf32> to vector<8x8xf32>
    %102 = vector.extract_strided_slice %95 {offsets = [3, 0, 0], sizes = [1, 8, 8], strides = [1, 1, 1]} : vector<4x8x8xf32> to vector<1x8x8xf32>
    %103 = vector.shape_cast %102 : vector<1x8x8xf32> to vector<8x8xf32>
    %104 = tpu.concatenate %97, %99, %101, %103 in 1 : vector<8x8xf32>, vector<8x8xf32>, vector<8x8xf32>, vector<8x8xf32> -> vector<8x32xf32>
    %cst_53 = arith.constant dense<0.000000e+00> : vector<8x32xf32>
    %105 = tpu.matmul %104, %31, %cst_53 {dimension_numbers = #tpu.dot_dimension_numbers<[1], [0], [0], [1], [0, 0, 1, 1], [], []>} : vector<8x32xf32>, vector<32x32xf32>, vector<8x32xf32> -> vector<8x32xf32>
    %106 = vector.broadcast %33 : vector<1x32xf32> to vector<8x32xf32>
    %107 = arith.addf %105, %106 : vector<8x32xf32>
    %108 = arith.addf %25, %107 : vector<8x32xf32>
    %cst_54 = arith.constant dense<0.000000e+00> : vector<8xf32>
    %109 = vector.multi_reduction <add>, %108, %cst_54 [1] : vector<8x32xf32> to vector<8xf32>
    %110 = vector.shape_cast %109 : vector<8xf32> to vector<8x1xf32>
    %cst_55 = arith.constant 3.200000e+01 : f32
    %111 = vector.broadcast %cst_55 : f32 to vector<8x1xf32>
    %112 = arith.divf %110, %111 : vector<8x1xf32>
    %113 = vector.broadcast %112 : vector<8x1xf32> to vector<8x32xf32>
    %114 = arith.subf %108, %113 : vector<8x32xf32>
    %115 = arith.mulf %114, %114 : vector<8x32xf32>
    %cst_56 = arith.constant dense<0.000000e+00> : vector<8xf32>
    %116 = vector.multi_reduction <add>, %115, %cst_56 [1] : vector<8x32xf32> to vector<8xf32>
    %117 = vector.shape_cast %116 : vector<8xf32> to vector<8x1xf32>
    %cst_57 = arith.constant 3.200000e+01 : f32
    %118 = vector.broadcast %cst_57 : f32 to vector<8x1xf32>
    %119 = arith.divf %117, %118 : vector<8x1xf32>
    %cst_58 = arith.constant 9.99999996E-13 : f32
    %120 = vector.broadcast %cst_58 : f32 to vector<8x1xf32>
    %121 = arith.addf %119, %120 : vector<8x1xf32>
    %122 = math.rsqrt %121 : vector<8x1xf32>
    %123 = vector.broadcast %112 : vector<8x1xf32> to vector<8x32xf32>
    %124 = arith.subf %108, %123 : vector<8x32xf32>
    %125 = vector.broadcast %122 : vector<8x1xf32> to vector<8x32xf32>
    %126 = arith.mulf %124, %125 : vector<8x32xf32>
    %127 = vector.broadcast %35 : vector<1x32xf32> to vector<8x32xf32>
    %128 = arith.mulf %126, %127 : vector<8x32xf32>
    %129 = vector.broadcast %37 : vector<1x32xf32> to vector<8x32xf32>
    %130 = arith.addf %128, %129 : vector<8x32xf32>
    %cst_59 = arith.constant dense<0.000000e+00> : vector<8x64xf32>
    %131 = tpu.matmul %130, %39, %cst_59 {dimension_numbers = #tpu.dot_dimension_numbers<[1], [0], [0], [1], [0, 0, 1, 1], [], []>} : vector<8x32xf32>, vector<32x64xf32>, vector<8x64xf32> -> vector<8x64xf32>
    %132 = vector.broadcast %41 : vector<1x64xf32> to vector<8x64xf32>
    %133 = arith.addf %131, %132 : vector<8x64xf32>
    %cst_60 = arith.constant 5.000000e-01 : f32
    %134 = vector.broadcast %cst_60 : f32 to vector<8x64xf32>
    %135 = arith.mulf %134, %133 : vector<8x64xf32>
    %cst_61 = arith.constant 2.000000e+00 : f32
    %136 = math.sqrt %cst_61 : f32
    %cst_62 = arith.constant 1.000000e+00 : f32
    %137 = arith.divf %cst_62, %136 : f32
    %138 = vector.broadcast %137 : f32 to vector<8x64xf32>
    %139 = arith.mulf %133, %138 : vector<8x64xf32>
    %140 = math.erf %139 : vector<8x64xf32>
    %cst_63 = arith.constant 1.000000e+00 : f32
    %141 = vector.broadcast %cst_63 : f32 to vector<8x64xf32>
    %142 = arith.addf %141, %140 : vector<8x64xf32>
    %143 = arith.mulf %135, %142 : vector<8x64xf32>
    %cst_64 = arith.constant dense<0.000000e+00> : vector<8x32xf32>
    %144 = tpu.matmul %143, %43, %cst_64 {dimension_numbers = #tpu.dot_dimension_numbers<[1], [0], [0], [1], [0, 0, 1, 1], [], []>} : vector<8x64xf32>, vector<64x32xf32>, vector<8x32xf32> -> vector<8x32xf32>
    %145 = vector.broadcast %45 : vector<1x32xf32> to vector<8x32xf32>
    %146 = arith.addf %144, %145 : vector<8x32xf32>
    %147 = arith.addf %130, %146 : vector<8x32xf32>
    %cst_65 = arith.constant dense<0.000000e+00> : vector<8xf32>
    %148 = vector.multi_reduction <add>, %147, %cst_65 [1] : vector<8x32xf32> to vector<8xf32>
    %149 = vector.shape_cast %148 : vector<8xf32> to vector<8x1xf32>
    %cst_66 = arith.constant 3.200000e+01 : f32
    %150 = vector.broadcast %cst_66 : f32 to vector<8x1xf32>
    %151 = arith.divf %149, %150 : vector<8x1xf32>
    %152 = vector.broadcast %151 : vector<8x1xf32> to vector<8x32xf32>
    %153 = arith.subf %147, %152 : vector<8x32xf32>
    %154 = arith.mulf %153, %153 : vector<8x32xf32>
    %cst_67 = arith.constant dense<0.000000e+00> : vector<8xf32>
    %155 = vector.multi_reduction <add>, %154, %cst_67 [1] : vector<8x32xf32> to vector<8xf32>
    %156 = vector.shape_cast %155 : vector<8xf32> to vector<8x1xf32>
    %cst_68 = arith.constant 3.200000e+01 : f32
    %157 = vector.broadcast %cst_68 : f32 to vector<8x1xf32>
    %158 = arith.divf %156, %157 : vector<8x1xf32>
    %cst_69 = arith.constant 9.99999996E-13 : f32
    %159 = vector.broadcast %cst_69 : f32 to vector<8x1xf32>
    %160 = arith.addf %158, %159 : vector<8x1xf32>
    %161 = math.rsqrt %160 : vector<8x1xf32>
    %162 = vector.broadcast %151 : vector<8x1xf32> to vector<8x32xf32>
    %163 = arith.subf %147, %162 : vector<8x32xf32>
    %164 = vector.broadcast %161 : vector<8x1xf32> to vector<8x32xf32>
    %165 = arith.mulf %163, %164 : vector<8x32xf32>
    %166 = vector.broadcast %47 : vector<1x32xf32> to vector<8x32xf32>
    %167 = arith.mulf %165, %166 : vector<8x32xf32>
    %168 = vector.broadcast %49 : vector<1x32xf32> to vector<8x32xf32>
    %169 = arith.addf %167, %168 : vector<8x32xf32>
    %c1 = arith.constant 1 : index
    %c0_70 = arith.constant 0 : index
    %c0_71 = arith.constant 0 : index
    %170 = vector.load %arg4[%c1, %c0_70, %c0_71] : memref<2x32x1536xf32, #tpu.memory_space<vmem>>, vector<1x32x1536xf32>
    %171 = vector.shape_cast %170 : vector<1x32x1536xf32> to vector<32x1536xf32>
    %c1_72 = arith.constant 1 : index
    %c0_73 = arith.constant 0 : index
    %c0_74 = arith.constant 0 : index
    %172 = vector.load %arg5[%c1_72, %c0_73, %c0_74] : memref<2x1x1536xf32, #tpu.memory_space<vmem>>, vector<1x1x1536xf32>
    %173 = vector.shape_cast %172 : vector<1x1x1536xf32> to vector<1x1536xf32>
    %c1_75 = arith.constant 1 : index
    %c0_76 = arith.constant 0 : index
    %c0_77 = arith.constant 0 : index
    %174 = vector.load %arg6[%c1_75, %c0_76, %c0_77] : memref<2x32x32xf32, #tpu.memory_space<vmem>>, vector<1x32x32xf32>
    %175 = vector.shape_cast %174 : vector<1x32x32xf32> to vector<32x32xf32>
    %c1_78 = arith.constant 1 : index
    %c0_79 = arith.constant 0 : index
    %c0_80 = arith.constant 0 : index
    %176 = vector.load %arg7[%c1_78, %c0_79, %c0_80] : memref<2x1x32xf32, #tpu.memory_space<vmem>>, vector<1x1x32xf32>
    %177 = vector.shape_cast %176 : vector<1x1x32xf32> to vector<1x32xf32>
    %c1_81 = arith.constant 1 : index
    %c0_82 = arith.constant 0 : index
    %c0_83 = arith.constant 0 : index
    %178 = vector.load %arg8[%c1_81, %c0_82, %c0_83] : memref<2x1x32xf32, #tpu.memory_space<vmem>>, vector<1x1x32xf32>
    %179 = vector.shape_cast %178 : vector<1x1x32xf32> to vector<1x32xf32>
    %c1_84 = arith.constant 1 : index
    %c0_85 = arith.constant 0 : index
    %c0_86 = arith.constant 0 : index
    %180 = vector.load %arg9[%c1_84, %c0_85, %c0_86] : memref<2x1x32xf32, #tpu.memory_space<vmem>>, vector<1x1x32xf32>
    %181 = vector.shape_cast %180 : vector<1x1x32xf32> to vector<1x32xf32>
    %c1_87 = arith.constant 1 : index
    %c0_88 = arith.constant 0 : index
    %c0_89 = arith.constant 0 : index
    %182 = vector.load %arg10[%c1_87, %c0_88, %c0_89] : memref<2x32x64xf32, #tpu.memory_space<vmem>>, vector<1x32x64xf32>
    %183 = vector.shape_cast %182 : vector<1x32x64xf32> to vector<32x64xf32>
    %c1_90 = arith.constant 1 : index
    %c0_91 = arith.constant 0 : index
    %c0_92 = arith.constant 0 : index
    %184 = vector.load %arg11[%c1_90, %c0_91, %c0_92] : memref<2x1x64xf32, #tpu.memory_space<vmem>>, vector<1x1x64xf32>
    %185 = vector.shape_cast %184 : vector<1x1x64xf32> to vector<1x64xf32>
    %c1_93 = arith.constant 1 : index
    %c0_94 = arith.constant 0 : index
    %c0_95 = arith.constant 0 : index
    %186 = vector.load %arg12[%c1_93, %c0_94, %c0_95] : memref<2x64x32xf32, #tpu.memory_space<vmem>>, vector<1x64x32xf32>
    %187 = vector.shape_cast %186 : vector<1x64x32xf32> to vector<64x32xf32>
    %c1_96 = arith.constant 1 : index
    %c0_97 = arith.constant 0 : index
    %c0_98 = arith.constant 0 : index
    %188 = vector.load %arg13[%c1_96, %c0_97, %c0_98] : memref<2x1x32xf32, #tpu.memory_space<vmem>>, vector<1x1x32xf32>
    %189 = vector.shape_cast %188 : vector<1x1x32xf32> to vector<1x32xf32>
    %c1_99 = arith.constant 1 : index
    %c0_100 = arith.constant 0 : index
    %c0_101 = arith.constant 0 : index
    %190 = vector.load %arg14[%c1_99, %c0_100, %c0_101] : memref<2x1x32xf32, #tpu.memory_space<vmem>>, vector<1x1x32xf32>
    %191 = vector.shape_cast %190 : vector<1x1x32xf32> to vector<1x32xf32>
    %c1_102 = arith.constant 1 : index
    %c0_103 = arith.constant 0 : index
    %c0_104 = arith.constant 0 : index
    %192 = vector.load %arg15[%c1_102, %c0_103, %c0_104] : memref<2x1x32xf32, #tpu.memory_space<vmem>>, vector<1x1x32xf32>
    %193 = vector.shape_cast %192 : vector<1x1x32xf32> to vector<1x32xf32>
    %cst_105 = arith.constant dense<0.000000e+00> : vector<8x1536xf32>
    %194 = tpu.matmul %169, %171, %cst_105 {dimension_numbers = #tpu.dot_dimension_numbers<[1], [0], [0], [1], [0, 0, 1, 1], [], []>} : vector<8x32xf32>, vector<32x1536xf32>, vector<8x1536xf32> -> vector<8x1536xf32>
    %195 = vector.broadcast %173 : vector<1x1536xf32> to vector<8x1536xf32>
    %196 = arith.addf %194, %195 : vector<8x1536xf32>
    %197 = vector.extract_strided_slice %196 {offsets = [0, 0], sizes = [8, 8], strides = [1, 1]} : vector<8x1536xf32> to vector<8x8xf32>
    %198 = vector.shape_cast %197 : vector<8x8xf32> to vector<1x8x8xf32>
    %199 = vector.extract_strided_slice %196 {offsets = [0, 128], sizes = [8, 8], strides = [1, 1]} : vector<8x1536xf32> to vector<8x8xf32>
    %200 = vector.shape_cast %199 : vector<8x8xf32> to vector<1x8x8xf32>
    %201 = vector.extract_strided_slice %196 {offsets = [0, 256], sizes = [8, 8], strides = [1, 1]} : vector<8x1536xf32> to vector<8x8xf32>
    %202 = vector.shape_cast %201 : vector<8x8xf32> to vector<1x8x8xf32>
    %203 = vector.extract_strided_slice %196 {offsets = [0, 384], sizes = [8, 8], strides = [1, 1]} : vector<8x1536xf32> to vector<8x8xf32>
    %204 = vector.shape_cast %203 : vector<8x8xf32> to vector<1x8x8xf32>
    %205 = tpu.concatenate %198, %200, %202, %204 in 0 : vector<1x8x8xf32>, vector<1x8x8xf32>, vector<1x8x8xf32>, vector<1x8x8xf32> -> vector<4x8x8xf32>
    %206 = vector.extract_strided_slice %196 {offsets = [0, 512], sizes = [8, 8], strides = [1, 1]} : vector<8x1536xf32> to vector<8x8xf32>
    %207 = vector.shape_cast %206 : vector<8x8xf32> to vector<1x8x8xf32>
    %208 = vector.extract_strided_slice %196 {offsets = [0, 640], sizes = [8, 8], strides = [1, 1]} : vector<8x1536xf32> to vector<8x8xf32>
    %209 = vector.shape_cast %208 : vector<8x8xf32> to vector<1x8x8xf32>
    %210 = vector.extract_strided_slice %196 {offsets = [0, 768], sizes = [8, 8], strides = [1, 1]} : vector<8x1536xf32> to vector<8x8xf32>
    %211 = vector.shape_cast %210 : vector<8x8xf32> to vector<1x8x8xf32>
    %212 = vector.extract_strided_slice %196 {offsets = [0, 896], sizes = [8, 8], strides = [1, 1]} : vector<8x1536xf32> to vector<8x8xf32>
    %213 = vector.shape_cast %212 : vector<8x8xf32> to vector<1x8x8xf32>
    %214 = tpu.concatenate %207, %209, %211, %213 in 0 : vector<1x8x8xf32>, vector<1x8x8xf32>, vector<1x8x8xf32>, vector<1x8x8xf32> -> vector<4x8x8xf32>
    %215 = vector.extract_strided_slice %196 {offsets = [0, 1024], sizes = [8, 8], strides = [1, 1]} : vector<8x1536xf32> to vector<8x8xf32>
    %216 = vector.shape_cast %215 : vector<8x8xf32> to vector<1x8x8xf32>
    %217 = vector.extract_strided_slice %196 {offsets = [0, 1152], sizes = [8, 8], strides = [1, 1]} : vector<8x1536xf32> to vector<8x8xf32>
    %218 = vector.shape_cast %217 : vector<8x8xf32> to vector<1x8x8xf32>
    %219 = vector.extract_strided_slice %196 {offsets = [0, 1280], sizes = [8, 8], strides = [1, 1]} : vector<8x1536xf32> to vector<8x8xf32>
    %220 = vector.shape_cast %219 : vector<8x8xf32> to vector<1x8x8xf32>
    %221 = vector.extract_strided_slice %196 {offsets = [0, 1408], sizes = [8, 8], strides = [1, 1]} : vector<8x1536xf32> to vector<8x8xf32>
    %222 = vector.shape_cast %221 : vector<8x8xf32> to vector<1x8x8xf32>
    %223 = tpu.concatenate %216, %218, %220, %222 in 0 : vector<1x8x8xf32>, vector<1x8x8xf32>, vector<1x8x8xf32>, vector<1x8x8xf32> -> vector<4x8x8xf32>
    %cst_106 = arith.constant 8.000000e+00 : f32
    %224 = math.sqrt %cst_106 : f32
    %cst_107 = arith.constant 1.000000e+00 : f32
    %225 = arith.divf %cst_107, %224 : f32
    "tpu.trace_start"() <{level = 10 : i32, message = "hqd,hkd->hqk"}> : () -> ()
    %cst_108 = arith.constant dense<0.000000e+00> : vector<4x8x8xf32>
    %226 = tpu.matmul %205, %214, %cst_108 {dimension_numbers = #tpu.dot_dimension_numbers<[2], [2], [1], [1], [0, 0, 0, 1, 1, 1], [0], [0]>} : vector<4x8x8xf32>, vector<4x8x8xf32>, vector<4x8x8xf32> -> vector<4x8x8xf32>
    "tpu.trace_stop"() : () -> ()
    %227 = vector.broadcast %225 : f32 to vector<4x8x8xf32>
    %228 = arith.mulf %226, %227 : vector<4x8x8xf32>
    %cst_109 = arith.constant dense<0xFF800000> : vector<4x8xf32>
    %229 = vector.multi_reduction <maximumf>, %228, %cst_109 [2] : vector<4x8x8xf32> to vector<4x8xf32>
    %230 = vector.shape_cast %229 : vector<4x8xf32> to vector<4x8x1xf32>
    %231 = vector.broadcast %230 : vector<4x8x1xf32> to vector<4x8x8xf32>
    %232 = arith.subf %228, %231 : vector<4x8x8xf32>
    %233 = math.exp %232 : vector<4x8x8xf32>
    %cst_110 = arith.constant dense<0.000000e+00> : vector<4x8xf32>
    %234 = vector.multi_reduction <add>, %233, %cst_110 [2] : vector<4x8x8xf32> to vector<4x8xf32>
    %235 = vector.shape_cast %234 : vector<4x8xf32> to vector<4x8x1xf32>
    %236 = tpu.reciprocal %235 {approx = true} : vector<4x8x1xf32> -> vector<4x8x1xf32>
    %237 = vector.broadcast %236 : vector<4x8x1xf32> to vector<4x8x8xf32>
    %238 = arith.mulf %233, %237 : vector<4x8x8xf32>
    "tpu.trace_start"() <{level = 10 : i32, message = "hqk,hkd->hqd"}> : () -> ()
    %cst_111 = arith.constant dense<0.000000e+00> : vector<4x8x8xf32>
    %239 = tpu.matmul %238, %223, %cst_111 {dimension_numbers = #tpu.dot_dimension_numbers<[2], [1], [1], [2], [0, 0, 0, 1, 1, 2], [0], [0]>} : vector<4x8x8xf32>, vector<4x8x8xf32>, vector<4x8x8xf32> -> vector<4x8x8xf32>
    "tpu.trace_stop"() : () -> ()
    %240 = vector.extract_strided_slice %239 {offsets = [0, 0, 0], sizes = [1, 8, 8], strides = [1, 1, 1]} : vector<4x8x8xf32> to vector<1x8x8xf32>
    %241 = vector.shape_cast %240 : vector<1x8x8xf32> to vector<8x8xf32>
    %242 = vector.extract_strided_slice %239 {offsets = [1, 0, 0], sizes = [1, 8, 8], strides = [1, 1, 1]} : vector<4x8x8xf32> to vector<1x8x8xf32>
    %243 = vector.shape_cast %242 : vector<1x8x8xf32> to vector<8x8xf32>
    %244 = vector.extract_strided_slice %239 {offsets = [2, 0, 0], sizes = [1, 8, 8], strides = [1, 1, 1]} : vector<4x8x8xf32> to vector<1x8x8xf32>
    %245 = vector.shape_cast %244 : vector<1x8x8xf32> to vector<8x8xf32>
    %246 = vector.extract_strided_slice %239 {offsets = [3, 0, 0], sizes = [1, 8, 8], strides = [1, 1, 1]} : vector<4x8x8xf32> to vector<1x8x8xf32>
    %247 = vector.shape_cast %246 : vector<1x8x8xf32> to vector<8x8xf32>
    %248 = tpu.concatenate %241, %243, %245, %247 in 1 : vector<8x8xf32>, vector<8x8xf32>, vector<8x8xf32>, vector<8x8xf32> -> vector<8x32xf32>
    %cst_112 = arith.constant dense<0.000000e+00> : vector<8x32xf32>
    %249 = tpu.matmul %248, %175, %cst_112 {dimension_numbers = #tpu.dot_dimension_numbers<[1], [0], [0], [1], [0, 0, 1, 1], [], []>} : vector<8x32xf32>, vector<32x32xf32>, vector<8x32xf32> -> vector<8x32xf32>
    %250 = vector.broadcast %177 : vector<1x32xf32> to vector<8x32xf32>
    %251 = arith.addf %249, %250 : vector<8x32xf32>
    %252 = arith.addf %169, %251 : vector<8x32xf32>
    %cst_113 = arith.constant dense<0.000000e+00> : vector<8xf32>
    %253 = vector.multi_reduction <add>, %252, %cst_113 [1] : vector<8x32xf32> to vector<8xf32>
    %254 = vector.shape_cast %253 : vector<8xf32> to vector<8x1xf32>
    %cst_114 = arith.constant 3.200000e+01 : f32
    %255 = vector.broadcast %cst_114 : f32 to vector<8x1xf32>
    %256 = arith.divf %254, %255 : vector<8x1xf32>
    %257 = vector.broadcast %256 : vector<8x1xf32> to vector<8x32xf32>
    %258 = arith.subf %252, %257 : vector<8x32xf32>
    %259 = arith.mulf %258, %258 : vector<8x32xf32>
    %cst_115 = arith.constant dense<0.000000e+00> : vector<8xf32>
    %260 = vector.multi_reduction <add>, %259, %cst_115 [1] : vector<8x32xf32> to vector<8xf32>
    %261 = vector.shape_cast %260 : vector<8xf32> to vector<8x1xf32>
    %cst_116 = arith.constant 3.200000e+01 : f32
    %262 = vector.broadcast %cst_116 : f32 to vector<8x1xf32>
    %263 = arith.divf %261, %262 : vector<8x1xf32>
    %cst_117 = arith.constant 9.99999996E-13 : f32
    %264 = vector.broadcast %cst_117 : f32 to vector<8x1xf32>
    %265 = arith.addf %263, %264 : vector<8x1xf32>
    %266 = math.rsqrt %265 : vector<8x1xf32>
    %267 = vector.broadcast %256 : vector<8x1xf32> to vector<8x32xf32>
    %268 = arith.subf %252, %267 : vector<8x32xf32>
    %269 = vector.broadcast %266 : vector<8x1xf32> to vector<8x32xf32>
    %270 = arith.mulf %268, %269 : vector<8x32xf32>
    %271 = vector.broadcast %179 : vector<1x32xf32> to vector<8x32xf32>
    %272 = arith.mulf %270, %271 : vector<8x32xf32>
    %273 = vector.broadcast %181 : vector<1x32xf32> to vector<8x32xf32>
    %274 = arith.addf %272, %273 : vector<8x32xf32>
    %cst_118 = arith.constant dense<0.000000e+00> : vector<8x64xf32>
    %275 = tpu.matmul %274, %183, %cst_118 {dimension_numbers = #tpu.dot_dimension_numbers<[1], [0], [0], [1], [0, 0, 1, 1], [], []>} : vector<8x32xf32>, vector<32x64xf32>, vector<8x64xf32> -> vector<8x64xf32>
    %276 = vector.broadcast %185 : vector<1x64xf32> to vector<8x64xf32>
    %277 = arith.addf %275, %276 : vector<8x64xf32>
    %cst_119 = arith.constant 5.000000e-01 : f32
    %278 = vector.broadcast %cst_119 : f32 to vector<8x64xf32>
    %279 = arith.mulf %278, %277 : vector<8x64xf32>
    %cst_120 = arith.constant 2.000000e+00 : f32
    %280 = math.sqrt %cst_120 : f32
    %cst_121 = arith.constant 1.000000e+00 : f32
    %281 = arith.divf %cst_121, %280 : f32
    %282 = vector.broadcast %281 : f32 to vector<8x64xf32>
    %283 = arith.mulf %277, %282 : vector<8x64xf32>
    %284 = math.erf %283 : vector<8x64xf32>
    %cst_122 = arith.constant 1.000000e+00 : f32
    %285 = vector.broadcast %cst_122 : f32 to vector<8x64xf32>
    %286 = arith.addf %285, %284 : vector<8x64xf32>
    %287 = arith.mulf %279, %286 : vector<8x64xf32>
    %cst_123 = arith.constant dense<0.000000e+00> : vector<8x32xf32>
    %288 = tpu.matmul %287, %187, %cst_123 {dimension_numbers = #tpu.dot_dimension_numbers<[1], [0], [0], [1], [0, 0, 1, 1], [], []>} : vector<8x64xf32>, vector<64x32xf32>, vector<8x32xf32> -> vector<8x32xf32>
    %289 = vector.broadcast %189 : vector<1x32xf32> to vector<8x32xf32>
    %290 = arith.addf %288, %289 : vector<8x32xf32>
    %291 = arith.addf %274, %290 : vector<8x32xf32>
    %cst_124 = arith.constant dense<0.000000e+00> : vector<8xf32>
    %292 = vector.multi_reduction <add>, %291, %cst_124 [1] : vector<8x32xf32> to vector<8xf32>
    %293 = vector.shape_cast %292 : vector<8xf32> to vector<8x1xf32>
    %cst_125 = arith.constant 3.200000e+01 : f32
    %294 = vector.broadcast %cst_125 : f32 to vector<8x1xf32>
    %295 = arith.divf %293, %294 : vector<8x1xf32>
    %296 = vector.broadcast %295 : vector<8x1xf32> to vector<8x32xf32>
    %297 = arith.subf %291, %296 : vector<8x32xf32>
    %298 = arith.mulf %297, %297 : vector<8x32xf32>
    %cst_126 = arith.constant dense<0.000000e+00> : vector<8xf32>
    %299 = vector.multi_reduction <add>, %298, %cst_126 [1] : vector<8x32xf32> to vector<8xf32>
    %300 = vector.shape_cast %299 : vector<8xf32> to vector<8x1xf32>
    %cst_127 = arith.constant 3.200000e+01 : f32
    %301 = vector.broadcast %cst_127 : f32 to vector<8x1xf32>
    %302 = arith.divf %300, %301 : vector<8x1xf32>
    %cst_128 = arith.constant 9.99999996E-13 : f32
    %303 = vector.broadcast %cst_128 : f32 to vector<8x1xf32>
    %304 = arith.addf %302, %303 : vector<8x1xf32>
    %305 = math.rsqrt %304 : vector<8x1xf32>
    %306 = vector.broadcast %295 : vector<8x1xf32> to vector<8x32xf32>
    %307 = arith.subf %291, %306 : vector<8x32xf32>
    %308 = vector.broadcast %305 : vector<8x1xf32> to vector<8x32xf32>
    %309 = arith.mulf %307, %308 : vector<8x32xf32>
    %310 = vector.broadcast %191 : vector<1x32xf32> to vector<8x32xf32>
    %311 = arith.mulf %309, %310 : vector<8x32xf32>
    %312 = vector.broadcast %193 : vector<1x32xf32> to vector<8x32xf32>
    %313 = arith.addf %311, %312 : vector<8x32xf32>
    %314 = vector.extract_strided_slice %313 {offsets = [0, 0], sizes = [1, 32], strides = [1, 1]} : vector<8x32xf32> to vector<1x32xf32>
    %c0_129 = arith.constant 0 : index
    %c0_130 = arith.constant 0 : index
    %315 = vector.load %arg16[%c0_129, %c0_130] : memref<32x32xf32, #tpu.memory_space<vmem>>, vector<32x32xf32>
    %cst_131 = arith.constant dense<0.000000e+00> : vector<1x32xf32>
    %316 = tpu.matmul %314, %315, %cst_131 {dimension_numbers = #tpu.dot_dimension_numbers<[1], [0], [0], [1], [0, 0, 1, 1], [], []>} : vector<1x32xf32>, vector<32x32xf32>, vector<1x32xf32> -> vector<1x32xf32>
    %c0_132 = arith.constant 0 : index
    %c0_133 = arith.constant 0 : index
    %317 = vector.load %arg17[%c0_132, %c0_133] : memref<1x32xf32, #tpu.memory_space<vmem>>, vector<1x32xf32>
    %318 = arith.addf %316, %317 : vector<1x32xf32>
    %319 = math.tanh %318 : vector<1x32xf32>
    %c0_134 = arith.constant 0 : index
    %c0_135 = arith.constant 0 : index
    %320 = vector.load %arg18[%c0_134, %c0_135] : memref<32x3xf32, #tpu.memory_space<vmem>>, vector<32x3xf32>
    %cst_136 = arith.constant dense<0.000000e+00> : vector<1x3xf32>
    %321 = tpu.matmul %319, %320, %cst_136 {dimension_numbers = #tpu.dot_dimension_numbers<[1], [0], [0], [1], [0, 0, 1, 1], [], []>} : vector<1x32xf32>, vector<32x3xf32>, vector<1x3xf32> -> vector<1x3xf32>
    %c0_137 = arith.constant 0 : index
    %c0_138 = arith.constant 0 : index
    %322 = vector.load %arg19[%c0_137, %c0_138] : memref<1x3xf32, #tpu.memory_space<vmem>>, vector<1x3xf32>
    %323 = arith.addf %321, %322 : vector<1x3xf32>
    %c0_139 = arith.constant 0 : index
    %c0_140 = arith.constant 0 : index
    %c0_141 = arith.constant 0 : index
    %324 = vector.load %arg20[%c0_139, %c0_140, %c0_141] : memref<1x1x3xf32, #tpu.memory_space<vmem>>, vector<1x1x3xf32>
    %325 = vector.shape_cast %324 : vector<1x1x3xf32> to vector<1x3xf32>
    %326 = vector.shape_cast %323 : vector<1x3xf32> to vector<1x1x3xf32>
    tpu.vector_store %arg20[%c0_139, %c0_140, %c0_141], %326 {strides = array<i32>} : memref<1x1x3xf32, #tpu.memory_space<vmem>>, vector<1x1x3xf32>,
    return
  }
  func.func @transform_0(%arg0: i32) -> (i32, i32, i32) {
    %c0_i32 = arith.constant 0 : i32
    %c0_i32_0 = arith.constant 0 : i32
    %c0_i32_1 = arith.constant 0 : i32
    return %arg0, %c0_i32, %c0_i32_0 : i32, i32, i32
  }
  func.func @transform_1(%arg0: i32) -> (i32, i32) {
    %c0_i32 = arith.constant 0 : i32
    %c0_i32_0 = arith.constant 0 : i32
    %c0_i32_1 = arith.constant 0 : i32
    return %c0_i32, %c0_i32_0 : i32, i32
  }
  func.func @transform_2(%arg0: i32) -> (i32, i32) {
    %c0_i32 = arith.constant 0 : i32
    %c0_i32_0 = arith.constant 0 : i32
    %c0_i32_1 = arith.constant 0 : i32
    return %c0_i32, %c0_i32_0 : i32, i32
  }
  func.func @transform_3(%arg0: i32) -> (i32, i32, i32) {
    %c0_i32 = arith.constant 0 : i32
    %c0_i32_0 = arith.constant 0 : i32
    %c0_i32_1 = arith.constant 0 : i32
    %c0_i32_2 = arith.constant 0 : i32
    return %c0_i32, %c0_i32_0, %c0_i32_1 : i32, i32, i32
  }
  func.func @transform_4(%arg0: i32) -> (i32, i32, i32) {
    %c0_i32 = arith.constant 0 : i32
    %c0_i32_0 = arith.constant 0 : i32
    %c0_i32_1 = arith.constant 0 : i32
    %c0_i32_2 = arith.constant 0 : i32
    return %c0_i32, %c0_i32_0, %c0_i32_1 : i32, i32, i32
  }
  func.func @transform_5(%arg0: i32) -> (i32, i32, i32) {
    %c0_i32 = arith.constant 0 : i32
    %c0_i32_0 = arith.constant 0 : i32
    %c0_i32_1 = arith.constant 0 : i32
    %c0_i32_2 = arith.constant 0 : i32
    return %c0_i32, %c0_i32_0, %c0_i32_1 : i32, i32, i32
  }
  func.func @transform_6(%arg0: i32) -> (i32, i32, i32) {
    %c0_i32 = arith.constant 0 : i32
    %c0_i32_0 = arith.constant 0 : i32
    %c0_i32_1 = arith.constant 0 : i32
    %c0_i32_2 = arith.constant 0 : i32
    return %c0_i32, %c0_i32_0, %c0_i32_1 : i32, i32, i32
  }
  func.func @transform_7(%arg0: i32) -> (i32, i32, i32) {
    %c0_i32 = arith.constant 0 : i32
    %c0_i32_0 = arith.constant 0 : i32
    %c0_i32_1 = arith.constant 0 : i32
    %c0_i32_2 = arith.constant 0 : i32
    return %c0_i32, %c0_i32_0, %c0_i32_1 : i32, i32, i32
  }
  func.func @transform_8(%arg0: i32) -> (i32, i32, i32) {
    %c0_i32 = arith.constant 0 : i32
    %c0_i32_0 = arith.constant 0 : i32
    %c0_i32_1 = arith.constant 0 : i32
    %c0_i32_2 = arith.constant 0 : i32
    return %c0_i32, %c0_i32_0, %c0_i32_1 : i32, i32, i32
  }
  func.func @transform_9(%arg0: i32) -> (i32, i32, i32) {
    %c0_i32 = arith.constant 0 : i32
    %c0_i32_0 = arith.constant 0 : i32
    %c0_i32_1 = arith.constant 0 : i32
    %c0_i32_2 = arith.constant 0 : i32
    return %c0_i32, %c0_i32_0, %c0_i32_1 : i32, i32, i32
  }
  func.func @transform_10(%arg0: i32) -> (i32, i32, i32) {
    %c0_i32 = arith.constant 0 : i32
    %c0_i32_0 = arith.constant 0 : i32
    %c0_i32_1 = arith.constant 0 : i32
    %c0_i32_2 = arith.constant 0 : i32
    return %c0_i32, %c0_i32_0, %c0_i32_1 : i32, i32, i32
  }
  func.func @transform_11(%arg0: i32) -> (i32, i32, i32) {
    %c0_i32 = arith.constant 0 : i32
    %c0_i32_0 = arith.constant 0 : i32
    %c0_i32_1 = arith.constant 0 : i32
    %c0_i32_2 = arith.constant 0 : i32
    return %c0_i32, %c0_i32_0, %c0_i32_1 : i32, i32, i32
  }
  func.func @transform_12(%arg0: i32) -> (i32, i32, i32) {
    %c0_i32 = arith.constant 0 : i32
    %c0_i32_0 = arith.constant 0 : i32
    %c0_i32_1 = arith.constant 0 : i32
    %c0_i32_2 = arith.constant 0 : i32
    return %c0_i32, %c0_i32_0, %c0_i32_1 : i32, i32, i32
  }
  func.func @transform_13(%arg0: i32) -> (i32, i32, i32) {
    %c0_i32 = arith.constant 0 : i32
    %c0_i32_0 = arith.constant 0 : i32
    %c0_i32_1 = arith.constant 0 : i32
    %c0_i32_2 = arith.constant 0 : i32
    return %c0_i32, %c0_i32_0, %c0_i32_1 : i32, i32, i32
  }
  func.func @transform_14(%arg0: i32) -> (i32, i32, i32) {
    %c0_i32 = arith.constant 0 : i32
    %c0_i32_0 = arith.constant 0 : i32
    %c0_i32_1 = arith.constant 0 : i32
    %c0_i32_2 = arith.constant 0 : i32
    return %c0_i32, %c0_i32_0, %c0_i32_1 : i32, i32, i32
  }
  func.func @transform_15(%arg0: i32) -> (i32, i32) {
    %c0_i32 = arith.constant 0 : i32
    %c0_i32_0 = arith.constant 0 : i32
    %c0_i32_1 = arith.constant 0 : i32
    return %c0_i32, %c0_i32_0 : i32, i32
  }
  func.func @transform_16(%arg0: i32) -> (i32, i32) {
    %c0_i32 = arith.constant 0 : i32
    %c0_i32_0 = arith.constant 0 : i32
    %c0_i32_1 = arith.constant 0 : i32
    return %c0_i32, %c0_i32_0 : i32, i32
  }
  func.func @transform_17(%arg0: i32) -> (i32, i32) {
    %c0_i32 = arith.constant 0 : i32
    %c0_i32_0 = arith.constant 0 : i32
    %c0_i32_1 = arith.constant 0 : i32
    return %c0_i32, %c0_i32_0 : i32, i32
  }
  func.func @transform_18(%arg0: i32) -> (i32, i32) {
    %c0_i32 = arith.constant 0 : i32
    %c0_i32_0 = arith.constant 0 : i32
    %c0_i32_1 = arith.constant 0 : i32
    return %c0_i32, %c0_i32_0 : i32, i32
  }
  func.func @transform_19(%arg0: i32) -> (i32, i32, i32) {
    %c0_i32 = arith.constant 0 : i32
    %c0_i32_0 = arith.constant 0 : i32
    %c0_i32_1 = arith.constant 0 : i32
    return %arg0, %c0_i32, %c0_i32_0 : i32, i32, i32
  }
}

</mosaic_0001>

<bundles_post_ra>
// kernel: bert_classifier_forward.1
= control target key start
LH: loop header
LB: loop body
LE: loop exit
PB: predicated region body
PF: predicated region fallthrough
CT: control target
= control target key end

     0   :  { %s5344_s0 = inlined_call_operand.vmem [shape: f32[2,8,32], index: 0, kind: input, shape index: {}]   ;;  %s5345_s1 = inlined_call_operand.vmem [shape: f32[1,32], index: 1, kind: input, shape index: {}]   ;;  %s5346_s2 = inlined_call_operand.vmem [shape: f32[1,32], index: 2, kind: input, shape index: {}]   ;;  %s5347_s3 = inlined_call_operand.hbm [shape: f32[2,32,1536], index: 3, kind: input, shape index: {}]   ;;  %s5348_s4 = inlined_call_operand.vmem [shape: f32[2,1,1536], index: 4, kind: input, shape index: {}]   ;;  %s5349_s5 = inlined_call_operand.vmem [shape: f32[2,32,32], index: 5, kind: input, shape index: {}]   ;;  %s5350_s6 = inlined_call_operand.vmem [shape: f32[2,1,32], index: 6, kind: input, shape index: {}]   ;;  %s5351_s7 = inlined_call_operand.vmem [shape: f32[2,1,32], index: 7, kind: input, shape index: {}]   ;;  %s5352_s8 = inlined_call_operand.vmem [shape: f32[2,1,32], index: 8, kind: input, shape index: {}]   ;;  %s5353_s9 = inlined_call_operand.vmem [shape: f32[2,32,64], index: 9, kind: input, shape index: {}]   ;;  %s5354_s10 = inlined_call_operand.vmem [shape: f32[2,1,64], index: 10, kind: input, shape index: {}]   ;;  %s5355_s11 = inlined_call_operand.vmem [shape: f32[2,64,32], index: 11, kind: input, shape index: {}]   ;;  %s5356_s12 = inlined_call_operand.vmem [shape: f32[2,1,32], index: 12, kind: input, shape index: {}]   ;;  %s5357_s13 = inlined_call_operand.vmem [shape: f32[2,1,32], index: 13, kind: input, shape index: {}]   ;;  %s5358_s14 = inlined_call_operand.vmem [shape: f32[2,1,32], index: 14, kind: input, shape index: {}]   ;;  %s5359_s15 = inlined_call_operand.vmem [shape: f32[32,32], index: 15, kind: input, shape index: {}]   ;;  %s5360_s16 = inlined_call_operand.vmem [shape: f32[1,32], index: 16, kind: input, shape index: {}]   ;;  %s5361_s17 = inlined_call_operand.vmem [shape: f32[32,3], index: 17, kind: input, shape index: {}]   ;;  %s5362_s18 = inlined_call_operand.vmem [shape: f32[1,3], index: 18, kind: input, shape index: {}]   ;;  %s5363_s19 = inlined_call_operand.hbm [shape: f32[2,1,3], index: 19, kind: output, shape index: {}]  }
   0x1   :  { %5375 = sst [smem:[#allocation14_spill]] %s5344_s0 }
   0x2   :  { %5376 = sst [smem:[#allocation15_spill]] %s5345_s1 }
   0x3   :  { %5377 = sst [smem:[#allocation16_spill]] %s5346_s2 }
   0x4   :  { %5378 = sst [smem:[#allocation17_spill]] %s5347_s3 }
   0x5   :  { %5379 = sst [smem:[#allocation18_spill]] %s5363_s19 }
   0x6   :  { %24 = vsyncpa [#allocation3], 0 }
   0x7   :  { %25 = vsyncpa [#allocation4], 0 }
   0x8   :  { %27 = vsyncpa [#allocation4 + $0x1], 0  ;;  %s4768_s0 = smov 0   ;;  %s4770_s30 = smov 0  }
   0x9   :  { %s4772_s20 = smov 0   ;;  %s4774_s21 = smov 0  }
   0xa LB: > { %5380 = sst [smem:[#allocation8_spill]] %s4644_s0  ;;  %s4789_s1 = sadd.s32 4294967295, %s4656_s21   ;;  %s4656_s21 = sphi %s4774_s21, %s5403_s21   ;;  %s4652_s20 = sphi %s4772_s20, %s5405_s20   ;;  %s4648_s30 = sphi %s4770_s30, %s5407_s30   ;;  %s4644_s0 = sphi %s4768_s0, %s5406_s0  }
   0xb   : > { %5381 = sst [smem:[#allocation9_spill]] %s4652_s20  ;;  %s3941_s22 = sadd.s32 4294967294, %s4656_s21  }
   0xc   : > { %5382 = sst [smem:[#allocation10_spill]] %s4656_s21  ;;  %s4793_s2 = sadd.s32 1, %s4656_s21  }
   0xd   : > { %5383 = sst [smem:[#allocation11_spill]] %s4793_s2  ;;  %s444_s23 = sadd.s32 1, %s4652_s20 }
   0xe   : > { %s441_s24 = ssub.s32 %s4656_s21, %s4793_s2  ;;  %p454_p0 = scmp.ne.s32.totalorder %s4652_s20, %s4648_s30 }
   0xf   : > { %p442_p1 = scmp.eq.s32.totalorder %s441_s24, 0  ;;  %p455_p2 = scmp.eq.s32.totalorder %s4789_s1, 1 }
  0x10   : > { %p460_p3 = scmp.ne.s32.totalorder %s4648_s30, %s4644_s0  ;;  %p461_p4 = scmp.eq.s32.totalorder %s3941_s22, 1 }
  0x11   : > { %s4804_s25 = scalar_select %p442_p1, %s4652_s20, %s444_s23  }
  0x12   : > { %p4806_p5 = por %p455_p2, %p454_p0  ;;  %p4810_p6 = por %p461_p4, %p460_p3 }
  0x13   : > { %5384 = sst [smem:[#allocation12_spill]] %s4804_s25  ;;  %p3942_p7 = scmp.ge.s32.totalorder %s4656_s21, 1 }
  0x14   : > { %s5385_s3 = scalar_select %p4806_p5, 1, 0 }
  0x15   : > { %s5386_s26 = scalar_select %p4810_p6, 1, 0 }
  0x16   : > { %p468_p8 = scmp.lt.s32.totalorder %s4656_s21, 3  ;;  %p5371_p9 = scmp.eq.s32.totalorder %s4789_s1, 0 }
  0x17   : > { %5387 = sst [smem:[#allocation13_spill]] %s5386_s26  ;;  %s4658_s28 = smov [#allocation2]  }
  0x18   : > { %p4817_p10 = pnand %p3942_p7, %p468_p8  ;;  %s486_s29 = sshll.u32 %s4658_s28, 4  ;;  %s487_s29 = int_to_ptr.vmem [resolvable:$true] %s486_s29 }
  0x19   : > { %s5390_s25 = sld [smem:[#allocation17_spill]] }
  0x1a   : > { %s5388_s27 = scalar_select %p4817_p10, 1, 0 }
  0x1b   : > { %p4462_p11 = pneg %p4817_p10 }
  0x1d   : > { %p4825_p12 = pnand %p5371_p9, %p4462_p11 }
  0x1f   : > { %s4562_s20 = scalar_lea.hbm %s5390_s25, 12288  ;;  %p4564_p0 = pneg %p4825_p12 }
  0x20   : > { %p4563_p13 = scmp.ne.s32.totalorder %s5390_s25, %s4562_s20  ;;  %p4569_p3 = scmp.lt.u32.totalorder %s4562_s20, %s5390_s25 }
  0x22   : > { %p4565_p1 = pnand %p4564_p0, %p4563_p13 }
  0x24   : > { %p4566_p2 = pneg %p4565_p1 }
  0x26   : > { %p4571_p4 = pnand %p4569_p3, %p4566_p2 }
  0x28   : > { %4574 = shalt.err (!%p4571_p4)
}
  0x29   : > { %s4575_s21 = scalar_lea.vmem %s487_s29, 12288  ;;  %p4583_p9 = scmp.lt.s32.totalorder %s487_s29, %s487_s29 }
  0x2a   : > { %p4576_p7 = scmp.ne.s32.totalorder %s487_s29, %s4575_s21  ;;  %p4584_p6 = scmp.lt.s32.totalorder %s4575_s21, %s4575_s21 }
  0x2c   : > { %p4578_p8 = pnand %p4576_p7, %p4564_p0  ;;  %p4585_p5 = por %p4584_p6, %p4583_p9 }
  0x2e   : > { %p4579_p11 = pneg %p4578_p8 }
  0x30   : > { %p4586_p10 = pnand %p4585_p5, %p4579_p11 }
  0x32   : > { %4589 = shalt.err (!%p4586_p10)
}
  0x33   : > { %s4659_s2 = smov 1536   ;;  %s4660_s26 = smov 96  }
  0x34   : > { %4465 = dma.hbm_to_vmem [thread:$0]  (!%p4825_p12), %s5390_s25, 12288, %s487_s29, [#allocation3], %s4659_s2, %s4659_s2, %s4660_s26  }
  0x35   : > { %p5391_p13 = scmp.ne.s32.totalorder %s5388_s27, 0 }
  0x36   : > { %p5392_p1 = scmp.eq.s32.totalorder (!%p5391_p13), %s4789_s1, 0 }
  0x37   : > { %554 = sbr.rel (%p5391_p13) target bundleno = 5595 (0x15db), region = 96 }
  0x3e   : > { %4635 = dma.done.wait (%p5392_p1), [#allocation3], 12288   ;;  %p5393_p0 = pmov %p5392_p1 }
  0x3f   : > { %p608_p5 = scmp.lt.s32.totalorder %s4789_s1, 1  ;;  %s5394_s28 = sld [smem:[#allocation14_spill]]  ;;  %vm615_vm0 = vcmask 261120   ;;  %v645_v7 = vld [vmem:[#allocation2 + $0x8] sm:$0xff]  ;;  %v647_v9 = vld [vmem:[#allocation2 + $0x18] sm:$0xff]  ;;  %v644_v12 = vld [vmem:[#allocation2] sm:$0xff] }
  0x40   : > { %4637 = vsyncadd (%p5393_p0), [#allocation3], 4294955008  ;;  %v657_v8 = vld [vmem:[#allocation2 + $0x68] sm:$0xff]  ;;  %v659_v11 = vld [vmem:[#allocation2 + $0x78] sm:$0xff]  ;;  %v4661_v37 = vmov 0.0   ;;  %s5395_s29 = sld [smem:[#allocation15_spill]] }
  0x41   : > { %s609_s0 = scalar_select %p608_p5, %s4789_s1, 1  ;;  %v4300_v10 = vpack.c.bf16 %v657_v8, %v645_v7  ;;  %v656_v13 = vld [vmem:[#allocation2 + $0x60] sm:$0xff]  ;;  %v4308_v14 = vpack.c.bf16 %v659_v11, %v647_v9  ;;  %v646_v16 = vld [vmem:[#allocation2 + $0x10] sm:$0xff]  ;;  %v669_v19 = vld [vmem:[#allocation2 + $0xc8] sm:$0xff]  ;;  %846 = vmatprep.mubr.f32.mxu0 %v4661_v37  ;;  %917 = vmatprep.mubr.f32.mxu1 %v4661_v37  ;;  %vm4662_vm1 = vmmov 0   ;;  %vm1208_vm2 = vcmask 64512  }
  0x42   : > { %v4302_v15 = vpack.c.bf16 %v656_v13, %v644_v12  ;;  %v658_v17 = vld [vmem:[#allocation2 + $0x70] sm:$0xff]  ;;  %v681_v20 = vld [vmem:[#allocation2 + $0x128] sm:$0xff]  ;;  %v671_v21 = vld [vmem:[#allocation2 + $0xd8] sm:$0xff]  ;;  %s5396_s23 = sld [smem:[#allocation16_spill]]  ;;  %s4664_s24 = smov 8   ;;  %vm1866_vm3 = vcmask 130048  }
  0x43   : > { %s3947_s20 = sshll.u32 %s609_s0, 3  ;;  %4301 = vmatprep.subr.bf16.mxu0 %v4300_v10  ;;  %v4310_v18 = vpack.c.bf16 %v658_v17, %v646_v16  ;;  %4309 = vmatprep.subr.bf16.mxu1 %v4308_v14  ;;  %v4304_v22 = vpack.c.bf16 %v681_v20, %v669_v19  ;;  %v683_v23 = vld [vmem:[#allocation2 + $0x138] sm:$0xff]  ;;  %v668_v24 = vld [vmem:[#allocation2 + $0xc0] sm:$0xff]  ;;  %v670_v28 = vld [vmem:[#allocation2 + $0xd0] sm:$0xff]  ;;  %s4665_s0 = smov 16   ;;  %vm1868_vm4 = vcmask 195584  }
  0x44   : > { %4303 = vmatpush1.bf16.msra.mxu0 %v4302_v15  ;;  %v680_v25 = vld [vmem:[#allocation2 + $0x120] sm:$0xff]  ;;  %v4312_v26 = vpack.c.bf16 %v683_v23, %v671_v21  ;;  %v682_v29 = vld [vmem:[#allocation2 + $0x130] sm:$0xff]  ;;  %v649_v31 = vld [vmem:[#allocation2 + $0x28] sm:$0xff]  ;;  %vm2067_vm5 = vcmask 523264   ;;  %s606_s22 = sand.u32 1, %s4648_s30   ;;  %s4033_s27 = sshll.u32 %s4789_s1, 4 }
  0x45   : > { %s611_s19 = scalar_lea.vmem %s5394_s28, %s3947_s20  ;;  %4311 = vmatpush1.bf16.msra.mxu1 %v4310_v18  ;;  %v4306_v27 = vpack.c.bf16 %v680_v25, %v668_v24  ;;  %4305 = vmatprep.subr.bf16.mxu0 %v4304_v22  ;;  %v4314_v30 = vpack.c.bf16 %v682_v29, %v670_v28  ;;  %v661_v32 = vld [vmem:[#allocation2 + $0x88] sm:$0xff]  ;;  %v651_v33 = vld [vmem:[#allocation2 + $0x38] sm:$0xff]  ;;  %v648_v44 = vld [vmem:[#allocation2 + $0x20] sm:$0xff]  ;;  %v719_v25 = vlaneseq  ;;  %s4666_s20 = smov 24   ;;  %vm3859_vm6 = vcmask 16384  }
  0x46   : > { %v612_v0 = vld [vmem:[%s611_s19] sm:$0xff]  ;;  %4313 = vmatprep.subr.bf16.mxu1 %v4312_v26  ;;  %v4316_v34 = vpack.c.bf16 %v661_v32, %v649_v31  ;;  %v663_v35 = vld [vmem:[#allocation2 + $0x98] sm:$0xff]  ;;  %v650_v47 = vld [vmem:[#allocation2 + $0x30] sm:$0xff]  ;;  %s5397_s2 = sld [smem:[#allocation18_spill]]  ;;  %p5398_p9 = scmp.ne.s32.totalorder %s5385_s3, 0 }
  0x47   : > { %v616_v1 = vsel %vm615_vm0, %v612_v0, 0.0  ;;  %v4324_v36 = vpack.c.bf16 %v663_v35, %v651_v33  ;;  %v3948_v41 = vld [vmem:[%s5395_s29] ss:$0 sm:$0xff]  ;;  %v662_v48 = vld [vmem:[#allocation2 + $0x90] sm:$0xff]  ;;  %v673_v49 = vld [vmem:[#allocation2 + $0xe8] sm:$0xff]  ;;  %v4890_v26 = vshrl.u32 %v719_v25, 7 }
  0x48   : > { %617 = vadd.xlane.f32.xlu0 %v616_v1  ;;  %4307 = vmatpush1.bf16.msra.mxu0 %v4306_v27  ;;  %v3949_v43 = vld [vmem:[%s5396_s23] ss:$0 sm:$0xff]  ;;  %v685_v50 = vld [vmem:[#allocation2 + $0x148] sm:$0xff]  ;;  %v675_v51 = vld [vmem:[#allocation2 + $0xf8] sm:$0xff]  ;;  %v4326_v55 = vpack.c.bf16 %v662_v48, %v650_v47  ;;  %s3862_s23 = scalar_lea.sflag [#allocation4], %s606_s22  ;;  %s4667_s1 = smov [#allocation5]  }
  0x49   : > { %4315 = vmatpush1.bf16.msra.mxu1 %v4314_v30  ;;  %4317 = vmatprep.subr.bf16.mxu0 %v4316_v34  ;;  %v660_v45 = vld [vmem:[#allocation2 + $0x80] sm:$0xff]  ;;  %v687_v52 = vld [vmem:[#allocation2 + $0x158] sm:$0xff]  ;;  %v4320_v59 = vpack.c.bf16 %v685_v50, %v673_v49  ;;  %v674_v61 = vld [vmem:[#allocation2 + $0xf0] sm:$0xff]  ;;  %v737_v31 = vsub.s32 4, %v4890_v26  ;;  %v741_v32 = vsub.s32 5, %v4890_v26  ;;  %v4898_v34 = vsub.s32 0, %v4890_v26 }
  0x4a   : > { %4325 = vmatprep.subr.bf16.mxu1 %v4324_v36  ;;  %v4318_v54 = vpack.c.bf16 %v660_v45, %v648_v44  ;;  %v672_v56 = vld [vmem:[#allocation2 + $0xe0] sm:$0xff]  ;;  %v4328_v60 = vpack.c.bf16 %v687_v52, %v675_v51  ;;  %v686_v62 = vld [vmem:[#allocation2 + $0x150] sm:$0xff]  ;;  %v653_v63 = vld [vmem:[#allocation2 + $0x48] sm:$0xff]  ;;  %v4901_v35 = vsub.s32 1, %v4890_v26  ;;  %s4594_s28 = sshll.u32 %s4667_s1, 4  ;;  %s4595_s28 = int_to_ptr.vmem [resolvable:$false] %s4594_s28 }
  0x4b   : > { %v684_v57 = vld [vmem:[#allocation2 + $0x140] sm:$0xff]  ;;  %v655_v1 = vld [vmem:[#allocation2 + $0x58] sm:$0xff]  ;;  %v654_v9 = vld [vmem:[#allocation2 + $0x50] sm:$0xff]  ;;  %s4596_s19 = scalar_lea.vmem %s4595_s28, 32 }
  0x4c   : > { %v666_v10 = vld [vmem:[#allocation2 + $0xb0] sm:$0xff]  ;;  %v677_v11 = vld [vmem:[#allocation2 + $0x108] sm:$0xff]  ;;  %v679_v13 = vld [vmem:[#allocation2 + $0x118] sm:$0xff]  ;;  %s5302_s26 = scalar_lea.hbm %s5397_s2, %s4033_s27 }
  0x4d   : > { %v689_v12 = vld [vmem:[#allocation2 + $0x168] sm:$0xff]  ;;  %v691_v14 = vld [vmem:[#allocation2 + $0x178] sm:$0xff]  ;;  %v4342_v16 = vpack.c.bf16 %v666_v10, %v654_v9  ;;  %v676_v17 = vld [vmem:[#allocation2 + $0x100] sm:$0xff] }
  0x4e   : > { %v4336_v18 = vpack.c.bf16 %v689_v12, %v677_v11  ;;  %v4344_v19 = vpack.c.bf16 %v691_v14, %v679_v13  ;;  %v688_v20 = vld [vmem:[#allocation2 + $0x160] sm:$0xff]  ;;  %v678_v21 = vld [vmem:[#allocation2 + $0x110] sm:$0xff] }
  0x4f   : > { %v690_v22 = vld [vmem:[#allocation2 + $0x170] sm:$0xff]  ;;  %v4338_v23 = vpack.c.bf16 %v688_v20, %v676_v17  ;;  %v692_v33 = vld [vmem:[%s5348_s4] sm:$0xff] }
  0x50   : > { %v4346_v24 = vpack.c.bf16 %v690_v22, %v678_v21  ;;  %v738_v36 = vrot.slane %v692_v33, %v737_v31 }
  0xd5   : > { %v618_v2 = vpop.xlane.xlu0 %617 }
  0xd6   : > { %v620_v3 = vmul.f32 0.03125, %v618_v2  ;;  %v667_v2 = vld [vmem:[#allocation2 + $0xb8] sm:$0xff] }
  0xd7   : > { %v4340_v8 = vpack.c.bf16 %v667_v2, %v655_v1 }
  0xd8   : > { %v621_v4 = vsub.f32 %v612_v0, %v620_v3  ;;  %v665_v0 = vld [vmem:[#allocation2 + $0xa8] sm:$0xff]  ;;  %v4322_v3 = vpack.c.bf16 %v684_v57, %v672_v56 }
  0xd9   : > { %v4332_v7 = vpack.c.bf16 %v665_v0, %v653_v63 }
  0xda   : > { %v622_v5 = vmul.f32 %v621_v4, %v621_v4 }
  0xdc   : > { %v623_v6 = vsel %vm615_vm0, %v622_v5, 0.0  ;;  %v652_v5 = vld [vmem:[#allocation2 + $0x40] sm:$0xff] }
  0xdd   : > { %624 = vadd.xlane.f32.xlu0 %v623_v6  ;;  %v664_v6 = vld [vmem:[#allocation2 + $0xa0] sm:$0xff] }
  0xde   : > { %v4334_v15 = vpack.c.bf16 %v664_v6, %v652_v5 }
 0x16a   : > { %v625_v38 = vpop.xlane.xlu0 %624 }
 0x16b   : > { %v626_v39 = vmul.f32 0.03125, %v625_v38  ;;  %v745_v38 = vsub.s32 6, %v4890_v26 }
 0x16d   : > { %v627_v40 = vadd.f32 1e-12, %v626_v39  ;;  %v742_v39 = vrot.slane %v692_v33, %v741_v32  ;;  %v746_v48 = vrot.slane %v692_v33, %v745_v38 }
 0x16f   : > { %4514 = vrsqrt.f32 %v627_v40  ;;  %v749_v40 = vsub.s32 7, %v4890_v26 }
 0x171   : > { %v750_v52 = vrot.slane %v692_v33, %v749_v40 }
 0x179   : > { %v4515_v42 = vpop.eup %4514 }
 0x17a   : > { %v629_v46 = vmul.f32 %v4515_v42, %v621_v4  ;;  %v4330_v4 = vpack.c.bf16 %v686_v62, %v674_v61  ;;  %v4911_v42 = vsub.s32 2, %v4890_v26 }
 0x17c   : > { %v636_v53 = vmul.f32 %v3948_v41, %v629_v46  ;;  %v722_v41 = vrot.slane %v692_v33, %v4898_v34  ;;  %v726_v46 = vrot.slane %v692_v33, %v4901_v35 }
 0x17e   : > { %v4866_v58 = vadd.f32 %v3949_v43, %v636_v53  ;;  %v4914_v43 = vsub.s32 3, %v4890_v26  ;;  %v693_v53 = vld [vmem:[%s5348_s4 + $0x8] sm:$0xf] }
 0x17f   : > { %v762_v61 = vrot.slane %v693_v53, %v4911_v42  ;;  %v758_v63 = vrot.slane %v693_v53, %v4901_v35 }
 0x180   : > { %3950 = vmatmul.mubr.msk.f32.vlgmr.msra.gmra.mrb[0].mxu0 %vm615_vm0, %v4866_v58  ;;  %3951 = vmatmul.mubr.msk.f32.vlgmr.msra.gmra.mrb[0].mxu1 %vm615_vm0, %v4866_v58  ;;  %v734_v56 = vrot.slane %v692_v33, %v4914_v43  ;;  %v766_v0 = vrot.slane %v693_v53, %v4914_v43 }
 0x181   : > { %4319 = vmatpush1.bf16.msra.mxu0 %v4318_v54  ;;  %4327 = vmatpush1.bf16.msra.mxu1 %v4326_v55  ;;  %v730_v55 = vrot.slane %v692_v33, %v4911_v42 }
 0x182   : > { %4321 = vmatprep.subr.bf16.mxu0 %v4320_v59  ;;  %4329 = vmatprep.subr.bf16.mxu1 %v4328_v60  ;;  %v754_v60 = vrot.slane %v693_v53, %v4898_v34 }
 0x183   : > { %988 = vmatprep.mubr.f32.mxu0 %v4661_v37  ;;  %1059 = vmatprep.mubr.f32.mxu1 %v4661_v37 }
 0x185   : > { %4323 = vmatpush1.bf16.msra.mxu0 %v4322_v3  ;;  %4331 = vmatpush1.bf16.msra.mxu1 %v4330_v4 }
 0x186   : > { %4333 = vmatprep.subr.bf16.mxu0 %v4332_v7  ;;  %4341 = vmatprep.subr.bf16.mxu1 %v4340_v8 }
 0x188   : > { %3952 = vmatmul.mubr.msk.f32.vlgmr.msra.gmra.mrb[2].mxu0 %vm615_vm0, %v4866_v58  ;;  %3953 = vmatmul.mubr.msk.f32.vlgmr.msra.gmra.mrb[2].mxu1 %vm615_vm0, %v4866_v58 }
 0x189   : > { %4335 = vmatpush1.bf16.msra.mxu0 %v4334_v15  ;;  %4343 = vmatpush1.bf16.msra.mxu1 %v4342_v16 }
 0x18a   : > { %4337 = vmatprep.subr.bf16.mxu0 %v4336_v18  ;;  %4345 = vmatprep.subr.bf16.mxu1 %v4344_v19 }
 0x18b   : > { %1130 = vmatprep.mubr.f32.mxu0 %v4661_v37  ;;  %1201 = vmatprep.mubr.f32.mxu1 %v4661_v37 }
 0x18d   : > { %4339 = vmatpush1.bf16.msra.mxu0 %v4338_v23  ;;  %4347 = vmatpush1.bf16.msra.mxu1 %v4346_v24 }
 0x18e   : > { %4116 = vmatprep.subr.mxu0 %v4661_v37  ;;  %4121 = vmatprep.subr.mxu1 %v4661_v37 }
 0x190   : > { %3954 = vmatmul.mubr.msk.f32.vlgmr.msra.gmra.mrb[4].mxu0 %vm615_vm0, %v4866_v58  ;;  %3955 = vmatmul.mubr.msk.f32.vlgmr.msra.gmra.mrb[4].mxu1 %vm615_vm0, %v4866_v58 }
 0x191   : > { %4118 = vmatprep.mubr.msk.f32.mxu0 %vm4662_vm1, %v4661_v37  ;;  %4123 = vmatprep.mubr.msk.f32.mxu1 %vm4662_vm1, %v4661_v37 }
 0x253   : > { %v848_v27 = vpop.f32.mrb[0].mxu0  ;;  %v919_v28 = vpop.f32.mrb[0].mxu1 }
 0x254   : > { %v850_v29 = vpop.f32.mrb[1].mxu0  ;;  %v921_v30 = vpop.f32.mrb[1].mxu1  ;;  %v849_v54 = vadd.f32 %v848_v27, %v722_v41  ;;  %v920_v1 = vadd.f32 %v919_v28, %v730_v55 }
 0x255   : > { %v851_v57 = vadd.f32 %v850_v29, %v726_v46  ;;  %v922_v4 = vadd.f32 %v921_v30, %v734_v56 }
 0x25b   : > { %v990_v44 = vpop.f32.mrb[2].mxu0  ;;  %v1061_v45 = vpop.f32.mrb[2].mxu1 }
 0x25c   : > { %v991_v47 = vadd.f32 %v990_v44, %v738_v36  ;;  %v992_v49 = vpop.f32.mrb[3].mxu0  ;;  %v1063_v50 = vpop.f32.mrb[3].mxu1  ;;  %v1062_v59 = vadd.f32 %v1061_v45, %v746_v48 }
 0x25d   : > { %v993_v51 = vadd.f32 %v992_v49, %v742_v39  ;;  %v1064_v62 = vadd.f32 %v1063_v50, %v750_v52 }
 0x25e   : > { %4117 = vmatpush3.xpose.msk.msra.mxu0 %vm1208_vm2, %v991_v47 }
 0x25f   : > { %4122 = vmatpush3.xpose.msk.msra.mxu1 %vm1208_vm2, %v993_v51  ;;  %4126 = vmatprep.subr.mxu0 %v4661_v37 }
 0x260   : > { %4131 = vmatprep.subr.mxu1 %v4661_v37 }
 0x261   : > { %4119 = vmatmul.mubr.msk.f32.vlgmr.msra.gmra.mrb[6].mxu0 %vm1208_vm2, %v849_v54 }
 0x262   : > { %4124 = vmatmul.mubr.msk.f32.vlgmr.msra.gmra.mrb[6].mxu1 %vm1208_vm2, %v851_v57  ;;  %4127 = vmatpush3.xpose.msk.msra.mxu0 %vm1208_vm2, %v1062_v59 }
 0x263   : > { %v1132_v2 = vpop.f32.mrb[4].mxu0  ;;  %v1203_v3 = vpop.f32.mrb[4].mxu1  ;;  %4132 = vmatpush3.xpose.msk.msra.mxu1 %vm1208_vm2, %v1064_v62  ;;  %4128 = vmatprep.mubr.msk.f32.mxu0 %vm4662_vm1, %v4661_v37 }
 0x264   : > { %v1133_v5 = vadd.f32 %v1132_v2, %v754_v60  ;;  %v4940_v6 = vadd.f32 %v1203_v3, %v762_v61  ;;  %v1134_v7 = vpop.f32.mrb[5].mxu0  ;;  %v1205_v8 = vpop.f32.mrb[5].mxu1  ;;  %4133 = vmatprep.mubr.msk.f32.mxu1 %vm4662_vm1, %v4661_v37  ;;  %4136 = vmatprep.subr.mxu0 %v4661_v37 }
 0x265   : > { %v1135_v9 = vadd.f32 %v1134_v7, %v758_v63  ;;  %v4945_v10 = vadd.f32 %v1205_v8, %v766_v0  ;;  %4129 = vmatmul.mubr.msk.f32.vlgmr.msra.gmra.mrb[8].mxu0 %vm1208_vm2, %v920_v1  ;;  %4141 = vmatprep.subr.mxu1 %v4661_v37  ;;  %v695_v7 = vld [vmem:[%s5349_s5 + $0x8] sm:$0xff]  ;;  %v4663_v8 = vmov 0.0|0.0  }
 0x266   : > { %4134 = vmatmul.mubr.msk.f32.vlgmr.msra.gmra.mrb[8].mxu1 %vm1208_vm2, %v922_v4  ;;  %4137 = vmatpush3.msra.mxu0 %v1133_v5 }
 0x267   : > { %4142 = vmatpush3.msra.mxu1 %v1135_v9  ;;  %4138 = vmatprep.mubr.msk.f32.mxu0 %vm4662_vm1, %v4661_v37 }
 0x268   : > { %4146 = vmatprep.subr.mxu0 %v4661_v37  ;;  %4143 = vmatprep.mubr.msk.f32.mxu1 %vm4662_vm1, %v4661_v37 }
 0x269   : > { %4151 = vmatprep.subr.mxu1 %v4661_v37 }
 0x334   : > { %v1281_v11 = vpop.f32.mrb[6].mxu0 }
 0x335   : > { %v1513_v12 = vmul.f32 0.35355338, %v1281_v11  ;;  %v4120_v13 = vpop.f32.mrb[7].mxu0  ;;  %v1357_v14 = vpop.f32.mrb[6].mxu1  ;;  %v697_v11 = vld [vmem:[%s5349_s5 + $0x18] sm:$0xff] }
 0x336   : > { %v4125_v15 = vpop.f32.mrb[7].mxu1  ;;  %v1514_v16 = vmul.f32 0.35355338, %v1357_v14 }
 0x337   : > { %v1517_v17 = vsel %vm1208_vm2, %v1513_v12, -inf }
 0x338   : > { %1518 = vmax.xlane.f32.xlu1 %v1517_v17  ;;  %v1433_v18 = vpop.f32.mrb[8].mxu0  ;;  %v1520_v24 = vsel %vm1208_vm2, %v1514_v16, -inf }
 0x339   : > { %v1515_v19 = vmul.f32 0.35355338, %v1433_v18  ;;  %v4130_v20 = vpop.f32.mrb[9].mxu0  ;;  %v1509_v21 = vpop.f32.mrb[8].mxu1 }
 0x33a   : > { %v4135_v22 = vpop.f32.mrb[9].mxu1  ;;  %v1516_v23 = vmul.f32 0.35355338, %v1509_v21 }
 0x33b   : > { %v1523_v25 = vsel %vm1208_vm2, %v1515_v19, -inf }
 0x33c   : > { %1521 = vmax.xlane.f32.xlu1 %v1520_v24  ;;  %1524 = vmax.xlane.f32.xlu0 %v1523_v25  ;;  %v1526_v27 = vsel %vm1208_vm2, %v1516_v23, -inf }
 0x340   : > { %1527 = vmax.xlane.f32.xlu1 %v1526_v27 }
 0x3c5   : > { %v1519_v28 = vpop.xlane.xlu1 %1518 }
 0x3c6   : > { %v1529_v29 = vsub.f32 %v1513_v12, %v1519_v28  ;;  %v3968_v28 = vld [vmem:[%s5350_s6] ss:$0 sm:$0xff] }
 0x3c8   : > { %v1533_v30 = vmul.f32 1.442695, %v1529_v29 }
 0x3c9   : > { %v1522_v33 = vpop.xlane.xlu1 %1521  ;;  %v1525_v36 = vpop.xlane.xlu0 %1524 }
 0x3ca   : > { %4516 = vpow2.f32 %v1533_v30  ;;  %v1530_v39 = vsub.f32 %v1514_v16, %v1522_v33  ;;  %v1531_v41 = vsub.f32 %v1515_v19, %v1525_v36 }
 0x3cc   : > { %v1535_v44 = vmul.f32 1.442695, %v1530_v39  ;;  %v1537_v45 = vmul.f32 1.442695, %v1531_v41 }
 0x3cd   : > { %v1528_v46 = vpop.xlane.xlu1 %1527 }
 0x3ce   : > { %4518 = vpow2.f32 %v1535_v44  ;;  %v1532_v47 = vsub.f32 %v1516_v23, %v1528_v46 }
 0x3cf   : > { %4520 = vpow2.f32 %v1537_v45 }
 0x3d0   : > { %v1539_v48 = vmul.f32 1.442695, %v1532_v47 }
 0x3d2   : > { %4522 = vpow2.f32 %v1539_v48  ;;  %v701_v48 = vld [vmem:[%s5353_s9] sm:$0xff] }
 0x3d4   : > { %v4517_v49 = vpop.eup %4516 }
 0x3d5   : > { %v1541_v50 = vsel %vm1208_vm2, %v4517_v49, 0.0 }
 0x3d6   : > { %1542 = vadd.xlane.f32.xlu0 %v1541_v50 }
 0x3d8   : > { %v4519_v51 = vpop.eup %4518 }
 0x3d9   : > { %v4521_v52 = vpop.eup %4520  ;;  %v1544_v53 = vsel %vm1208_vm2, %v4519_v51, 0.0 }
 0x3da   : > { %1545 = vadd.xlane.f32.xlu1 %v1544_v53  ;;  %v1547_v54 = vsel %vm1208_vm2, %v4521_v52, 0.0 }
 0x3db   : > { %1548 = vadd.xlane.f32.xlu0 %v1547_v54 }
 0x3dc   : > { %v4523_v55 = vpop.eup %4522 }
 0x3dd   : > { %v1550_v56 = vsel %vm1208_vm2, %v4523_v55, 0.0 }
 0x3de   : > { %1551 = vadd.xlane.f32.xlu1 %v1550_v56 }
 0x463   : > { %v1543_v57 = vpop.xlane.xlu0 %1542 }
 0x464   : > { %4524 = vrcp.f32 %v1543_v57  ;;  %v3970_v57 = vld [vmem:[%s5351_s7] ss:$0 sm:$0xff] }
 0x467   : > { %v1546_v59 = vpop.xlane.xlu1 %1545 }
 0x468   : > { %4526 = vrcp.f32 %v1546_v59  ;;  %v1549_v60 = vpop.xlane.xlu0 %1548 }
 0x469   : > { %4528 = vrcp.f32 %v1549_v60  ;;  %v3971_v60 = vld [vmem:[%s5352_s8] ss:$0 sm:$0xff] }
 0x46b   : > { %v1552_v61 = vpop.xlane.xlu1 %1551 }
 0x46c   : > { %4530 = vrcp.f32 %v1552_v61 }
 0x46e   : > { %v4525_v62 = vpop.eup %4524 }
 0x46f   : > { %v1557_v63 = vmul.f32 %v4525_v62, %v4517_v49  ;;  %v702_v49 = vld [vmem:[%s5353_s9 + $0x8] sm:$0xff] }
 0x470   : > { %v4355_v50 = vpack.c.bf16 %v702_v49, %v701_v48  ;;  %v2182_v48 = vld [vmem:[#allocation2 + $0x1e0] sm:$0xff] }
 0x471   : > { %4139 = vmatmul.mubr.msk.f32.vlgmr.msra.gmra.mrb[10].mxu0 %vm1208_vm2, %v1557_v63  ;;  %v706_v63 = vld [vmem:[%s5355_s11] sm:$0xff] }
 0x472   : > { %v4527_v0 = vpop.eup %4526  ;;  %4147 = vmatpush3.msra.mxu0 %v4940_v6  ;;  %4148 = vmatprep.mubr.msk.f32.mxu0 %vm4662_vm1, %v4661_v37  ;;  %v694_v6 = vld [vmem:[%s5349_s5] sm:$0xff] }
 0x473   : > { %v4529_v1 = vpop.eup %4528  ;;  %v1558_v2 = vmul.f32 %v4527_v0, %v4519_v51  ;;  %4348 = vmatprep.subr.bf16.mxu0 %v4663_v8  ;;  %v4349_v9 = vpack.c.bf16 %v695_v7, %v694_v6  ;;  %v704_v51 = vld [vmem:[%s5353_s9 + $0x18] sm:$0xff]  ;;  %v707_v0 = vld [vmem:[%s5355_s11 + $0x8] sm:$0xff] }
 0x474   : > { %v1559_v3 = vmul.f32 %v4529_v1, %v4521_v52  ;;  %v4361_v1 = vpack.c.bf16 %v707_v0, %v706_v63  ;;  %v711_v6 = vld [vmem:[%s5355_s11 + $0x28] sm:$0xff]  ;;  %v2198_v63 = vld [vmem:[#allocation2 + $0x260] sm:$0xff] }
 0x475   : > { %4144 = vmatmul.mubr.msk.f32.vlgmr.msra.gmra.mrb[10].mxu1 %vm1208_vm2, %v1558_v2  ;;  %v708_v2 = vld [vmem:[%s5355_s11 + $0x10] sm:$0xff]  ;;  %v2210_v0 = vld [vmem:[#allocation2 + $0x2c0] sm:$0xff] }
 0x476   : > { %v4531_v4 = vpop.eup %4530  ;;  %4149 = vmatmul.mubr.msk.f32.vlgmr.msra.gmra.mrb[12].mxu0 %vm1208_vm2, %v1559_v3  ;;  %4152 = vmatpush3.msra.mxu1 %v4945_v10  ;;  %v696_v10 = vld [vmem:[%s5349_s5 + $0x10] sm:$0xff]  ;;  %v709_v3 = vld [vmem:[%s5355_s11 + $0x18] sm:$0xff] }
 0x477   : > { %v1560_v5 = vmul.f32 %v4531_v4, %v4523_v55  ;;  %4153 = vmatprep.mubr.msk.f32.mxu1 %vm4662_vm1, %v4661_v37  ;;  %4164 = vmatprep.mubr.msk.f32.mxu0 %vm4662_vm1, %v4661_v37  ;;  %v4352_v12 = vpack.c.bf16 %v697_v11, %v696_v10  ;;  %v4364_v4 = vpack.c.bf16 %v709_v3, %v708_v2  ;;  %v713_v10 = vld [vmem:[%s5355_s11 + $0x38] sm:$0xff] }
 0x478   : > { %4354 = vmatprep.subr.bf16.mxu1 %v4663_v8  ;;  %4350 = vmatpush3.bf16.msra.mxu0 %v4349_v9  ;;  %v712_v9 = vld [vmem:[%s5355_s11 + $0x30] sm:$0xff]  ;;  %v2173_v2 = vld [vmem:[#allocation2 + $0x198] sm:$0xff] }
 0x479   : > { %4154 = vmatmul.mubr.msk.f32.vlgmr.msra.gmra.mrb[12].mxu1 %vm1208_vm2, %v1560_v5  ;;  %4351 = vmatprep.subr.bf16.mxu0 %v4663_v8  ;;  %v710_v5 = vld [vmem:[%s5355_s11 + $0x20] sm:$0xff]  ;;  %v4370_v11 = vpack.c.bf16 %v713_v10, %v712_v9  ;;  %v2185_v3 = vld [vmem:[#allocation2 + $0x1f8] sm:$0xff] }
 0x47a   : > { %4175 = vmatprep.mubr.msk.f32.mxu1 %vm4662_vm1, %v4661_v37  ;;  %4356 = vmatpush3.bf16.msra.mxu1 %v4355_v50  ;;  %v4367_v7 = vpack.c.bf16 %v711_v6, %v710_v5  ;;  %v4380_v5 = vpack.c.bf16 %v2185_v3, %v2173_v2  ;;  %v2191_v6 = vld [vmem:[#allocation2 + $0x228] sm:$0xff]  ;;  %v2204_v3 = vld [vmem:[#allocation2 + $0x290] sm:$0xff] }
 0x47b   : > { %4357 = vmatprep.subr.bf16.mxu1 %v4663_v8 }
 0x47c   : > { %4353 = vmatpush3.bf16.msra.mxu0 %v4352_v12  ;;  %v3972_v12 = vld [vmem:[%s5354_s10] ss:$0 sm:$0xff] }
 0x47d   : > { %4360 = vmatprep.subr.bf16.mxu0 %v4663_v8 }
 0x544   : > { %v1630_v13 = vpop.f32.mrb[10].mxu0 }
 0x545   : > { %v4140_v14 = vpop.f32.mrb[11].mxu0 }
 0x548   : > { %v1703_v15 = vpop.f32.mrb[10].mxu1 }
 0x549   : > { %v1776_v16 = vpop.f32.mrb[12].mxu0  ;;  %v4145_v17 = vpop.f32.mrb[11].mxu1  ;;  %1854 = vrot.lane.b32.xlu0 %v1703_v15, %s4664_s24 }
 0x54a   : > { %1858 = vrot.lane.b32.xlu1 %v1776_v16, %s4665_s0  ;;  %v4150_v18 = vpop.f32.mrb[13].mxu0 }
 0x54c   : > { %v1849_v19 = vpop.f32.mrb[12].mxu1 }
 0x54d   : > { %v4155_v20 = vpop.f32.mrb[13].mxu1 }
 0x54e   : > { %1862 = vrot.lane.b32.xlu1 %v1849_v19, %s4666_s20 }
 0x5bb   : > { %v1855_v21 = vpop.permute.xlu0 %1854 }
 0x5bc   : > { %v1859_v22 = vpop.permute.xlu1 %1858  ;;  %v1865_v23 = vsel %vm1208_vm2, %v1630_v13, %v1855_v21  ;;  %v3974_v21 = vld [vmem:[%s5356_s12] ss:$0 sm:$0xff] }
 0x5bd   : > { %v1867_v24 = vsel %vm1866_vm3, %v1865_v23, %v1859_v22 }
 0x5c0   : > { %v1863_v25 = vpop.permute.xlu1 %1862 }
 0x5c1   : > { %v1869_v27 = vsel %vm1868_vm4, %v1867_v24, %v1863_v25 }
 0x5c2   : > { %4165 = vmatmul.mubr.msk.f32.vlgmr.msra.gmra.mrb[14].mxu0 %vm615_vm0, %v1869_v27 }
 0x5c3   : > { %4194 = vmatprep.mubr.msk.f32.mxu0 %vm4662_vm1, %v4661_v37  ;;  %4362 = vmatpush3.bf16.msra.mxu0 %v4361_v1  ;;  %v4394_v1 = vpack.c.bf16 %v2210_v0, %v2198_v63  ;;  %v2205_v63 = vld [vmem:[#allocation2 + $0x298] sm:$0xff] }
 0x5c4   : > { %4363 = vmatprep.subr.bf16.mxu0 %v4663_v8  ;;  %v2217_v0 = vld [vmem:[#allocation2 + $0x2f8] sm:$0xff] }
 0x5c5   : > { %v4416_v2 = vpack.c.bf16 %v2217_v0, %v2205_v63 }
 0x5c7   : > { %4365 = vmatpush3.bf16.msra.mxu0 %v4364_v4  ;;  %v2179_v4 = vld [vmem:[#allocation2 + $0x1c8] sm:$0xff] }
 0x5c8   : > { %4366 = vmatprep.subr.bf16.mxu0 %v4663_v8 }
 0x5cb   : > { %4368 = vmatpush3.bf16.msra.mxu0 %v4367_v7  ;;  %v4404_v7 = vpack.c.bf16 %v2191_v6, %v2179_v4  ;;  %v2216_v4 = vld [vmem:[#allocation2 + $0x2f0] sm:$0xff] }
 0x5cc   : > { %4369 = vmatprep.subr.bf16.mxu0 %v4663_v8  ;;  %v3978_v6 = vld [vmem:[%s5348_s4 + $0xc] sm:$0xff] }
 0x5cf   : > { %4371 = vmatpush3.bf16.msra.mxu0 %v4370_v11 }
 0x695   : > { %v1945_v29 = vpop.f32.mrb[14].mxu0 }
 0x696   : > { %v1946_v30 = vadd.f32 %v3968_v28, %v1945_v29  ;;  %v4166_v33 = vpop.f32.mrb[15].mxu0 }
 0x698   : > { %v1949_v36 = vadd.f32 %v1946_v30, %v4866_v58  ;;  %v703_v58 = vld [vmem:[%s5353_s9 + $0x10] sm:$0xff] }
 0x699   : > { %v4358_v52 = vpack.c.bf16 %v704_v51, %v703_v58  ;;  %v2174_v58 = vld [vmem:[#allocation2 + $0x1a0] sm:$0xff] }
 0x69a   : > { %v1950_v39 = vsel %vm615_vm0, %v1949_v36, 0.0  ;;  %v2186_v51 = vld [vmem:[#allocation2 + $0x200] sm:$0xff] }
 0x69b   : > { %1951 = vadd.xlane.f32.xlu1 %v1950_v39  ;;  %4359 = vmatpush3.bf16.msra.mxu1 %v4358_v52  ;;  %v2171_v39 = vld [vmem:[#allocation2 + $0x188] sm:$0xff]  ;;  %v4390_v52 = vpack.c.bf16 %v2186_v51, %v2174_v58  ;;  %v2201_v58 = vld [vmem:[#allocation2 + $0x278] sm:$0xff] }
 0x69c   : > { %v2213_v51 = vld [vmem:[#allocation2 + $0x2d8] sm:$0xff] }
 0x728   : > { %v1952_v41 = vpop.xlane.xlu1 %1951 }
 0x729   : > { %v1953_v44 = vmul.f32 0.03125, %v1952_v41  ;;  %v2183_v41 = vld [vmem:[#allocation2 + $0x1e8] sm:$0xff] }
 0x72b   : > { %v1954_v45 = vsub.f32 %v1949_v36, %v1953_v44  ;;  %v2175_v44 = vld [vmem:[#allocation2 + $0x1a8] sm:$0xff] }
 0x72d   : > { %v1955_v46 = vmul.f32 %v1954_v45, %v1954_v45 }
 0x72f   : > { %v1956_v47 = vsel %vm615_vm0, %v1955_v46, 0.0  ;;  %v2187_v46 = vld [vmem:[#allocation2 + $0x208] sm:$0xff] }
 0x730   : > { %1957 = vadd.xlane.f32.xlu0 %v1956_v47  ;;  %v2170_v47 = vld [vmem:[#allocation2 + $0x180] sm:$0xff]  ;;  %v4388_v49 = vpack.c.bf16 %v2187_v46, %v2175_v44  ;;  %v2189_v46 = vld [vmem:[#allocation2 + $0x218] sm:$0xff] }
 0x731   : > { %v4374_v50 = vpack.c.bf16 %v2182_v48, %v2170_v47  ;;  %v2214_v44 = vld [vmem:[#allocation2 + $0x2e0] sm:$0xff] }
 0x732   : > { %4389 = vmatprep.subr.bf16.mxu0 %v4388_v49  ;;  %v2176_v49 = vld [vmem:[#allocation2 + $0x1b0] sm:$0xff] }
 0x7bd   : > { %v1958_v53 = vpop.xlane.xlu0 %1957 }
 0x7be   : > { %v1959_v54 = vmul.f32 0.03125, %v1958_v53  ;;  %v2195_v53 = vld [vmem:[#allocation2 + $0x248] sm:$0xff] }
 0x7c0   : > { %v1960_v55 = vadd.f32 1e-12, %v1959_v54  ;;  %v2207_v54 = vld [vmem:[#allocation2 + $0x2a8] sm:$0xff] }
 0x7c2   : > { %4532 = vrsqrt.f32 %v1960_v55  ;;  %v2199_v55 = vld [vmem:[#allocation2 + $0x268] sm:$0xff] }
 0x7cc   : > { %v4533_v56 = vpop.eup %4532 }
 0x7cd   : > { %v1962_v59 = vmul.f32 %v4533_v56, %v1954_v45  ;;  %v4372_v45 = vpack.c.bf16 %v2183_v41, %v2171_v39  ;;  %v4376_v56 = vpack.c.bf16 %v2207_v54, %v2195_v53  ;;  %v2208_v39 = vld [vmem:[#allocation2 + $0x2b0] sm:$0xff]  ;;  %v2202_v41 = vld [vmem:[#allocation2 + $0x280] sm:$0xff]  ;;  %v4400_v53 = vpack.c.bf16 %v2213_v51, %v2201_v58 }
 0x7ce   : > { %v4410_v47 = vpack.c.bf16 %v2214_v44, %v2202_v41  ;;  %v2200_v54 = vld [vmem:[#allocation2 + $0x270] sm:$0xff] }
 0x7cf   : > { %v1969_v61 = vmul.f32 %v3970_v57, %v1962_v59  ;;  %4373 = vmatprep.subr.bf16.mxu1 %v4372_v45  ;;  %v2211_v57 = vld [vmem:[#allocation2 + $0x2c8] sm:$0xff]  ;;  %v2194_v59 = vld [vmem:[#allocation2 + $0x240] sm:$0xff]  ;;  %v2177_v45 = vld [vmem:[#allocation2 + $0x1b8] sm:$0xff] }
 0x7d0   : > { %v4396_v48 = vpack.c.bf16 %v2189_v46, %v2177_v45 }
 0x7d1   : > { %v1976_v62 = vadd.f32 %v3971_v60, %v1969_v61  ;;  %v2206_v60 = vld [vmem:[#allocation2 + $0x2a0] sm:$0xff]  ;;  %v4392_v61 = vpack.c.bf16 %v2211_v57, %v2199_v55  ;;  %v2212_v55 = vld [vmem:[#allocation2 + $0x2d0] sm:$0xff]  ;;  %v2193_v57 = vld [vmem:[#allocation2 + $0x238] sm:$0xff] }
 0x7d3   : > { %4176 = vmatmul.mubr.msk.f32.vlgmr.msra.gmra.mrb[14].mxu1 %vm615_vm0, %v1976_v62 }
 0x7d4   : > { %2383 = vmatprep.mubr.f32.mxu1 %v4661_v37  ;;  %4375 = vmatpush1.bf16.msra.mxu1 %v4374_v50  ;;  %v2188_v50 = vld [vmem:[#allocation2 + $0x210] sm:$0xff] }
 0x7d5   : > { %4377 = vmatprep.subr.bf16.mxu1 %v4376_v56  ;;  %v2181_v56 = vld [vmem:[#allocation2 + $0x1d8] sm:$0xff] }
 0x8a6   : > { %v2052_v13 = vpop.f32.mrb[14].mxu1 }
 0x8a7   : > { %v2053_v14 = vadd.f32 %v3972_v12, %v2052_v13  ;;  %v4177_v15 = vpop.f32.mrb[15].mxu1  ;;  %v3976_v12 = vld [vmem:[%s5357_s13] ss:$0 sm:$0xff] }
 0x8a8   : > { %v2172_v15 = vld [vmem:[#allocation2 + $0x190] sm:$0xff] }
 0x8a9   : > { %v2057_v16 = vmul.f32 0.70710677, %v2053_v14  ;;  %v2056_v18 = vmul.f32 0.5, %v2053_v14  ;;  %v3977_v14 = vld [vmem:[%s5358_s14] ss:$0 sm:$0xff] }
 0x8ab   : > { %4534 = verf.f32 %v2057_v16  ;;  %v2184_v16 = vld [vmem:[#allocation2 + $0x1f0] sm:$0xff] }
 0x8b5   : > { %v4535_v17 = vpop.eup %4534 }
 0x8b6   : > { %v2059_v19 = vadd.f32 1.0, %v4535_v17 }
 0x8b8   : > { %v2060_v20 = vmul.f32 %v2059_v19, %v2056_v18  ;;  %v2178_v18 = vld [vmem:[#allocation2 + $0x1c0] sm:$0xff] }
 0x8b9   : > { %v2190_v19 = vld [vmem:[#allocation2 + $0x220] sm:$0xff] }
 0x8ba   : > { %4195 = vmatmul.mubr.msk.f32.vlgmr.msra.gmra.mrb[16].mxu0 %vm2067_vm5, %v2060_v20  ;;  %v2197_v20 = vld [vmem:[#allocation2 + $0x258] sm:$0xff] }
 0x8bb   : > { %2525 = vmatprep.mubr.f32.mxu0 %v4661_v37  ;;  %4391 = vmatpush1.bf16.msra.mxu0 %v4390_v52  ;;  %v4398_v52 = vpack.c.bf16 %v2188_v50, %v2176_v49 }
 0x8bc   : > { %4393 = vmatprep.subr.bf16.mxu0 %v4392_v61  ;;  %v2180_v61 = vld [vmem:[#allocation2 + $0x1d0] sm:$0xff] }
 0x8bf   : > { %4395 = vmatpush1.bf16.msra.mxu0 %v4394_v1 }
 0x8c0   : > { %4405 = vmatprep.subr.bf16.mxu0 %v4404_v7  ;;  %v2275_v7 = vrot.slane %v3978_v6, %v737_v31 }
 0x98d   : > { %v2137_v22 = vpop.f32.mrb[16].mxu0 }
 0x98e   : > { %v2138_v23 = vadd.f32 %v3974_v21, %v2137_v22  ;;  %v4196_v24 = vpop.f32.mrb[17].mxu0  ;;  %v2209_v21 = vld [vmem:[#allocation2 + $0x2b8] sm:$0xff]  ;;  %v2203_v22 = vld [vmem:[#allocation2 + $0x288] sm:$0xff] }
 0x990   : > { %v2141_v25 = vadd.f32 %v2138_v23, %v1976_v62  ;;  %v4378_v62 = vpack.c.bf16 %v2206_v60, %v2194_v59  ;;  %v2215_v23 = vld [vmem:[#allocation2 + $0x2e8] sm:$0xff]  ;;  %v4402_v59 = vpack.c.bf16 %v2212_v55, %v2200_v54  ;;  %v4412_v60 = vpack.c.bf16 %v2193_v57, %v2181_v56 }
 0x992   : > { %v2142_v27 = vsel %vm615_vm0, %v2141_v25, 0.0  ;;  %4379 = vmatpush1.bf16.msra.mxu1 %v4378_v62  ;;  %v2192_v62 = vld [vmem:[#allocation2 + $0x230] sm:$0xff] }
 0x993   : > { %2143 = vadd.xlane.f32.xlu0 %v2142_v27  ;;  %4381 = vmatprep.subr.bf16.mxu1 %v4380_v5  ;;  %v4406_v27 = vpack.c.bf16 %v2190_v19, %v2178_v18  ;;  %v4414_v1 = vpack.c.bf16 %v2192_v62, %v2180_v61  ;;  %v4418_v5 = vpack.c.bf16 %v2216_v4, %v2204_v3 }
 0xa20   : > { %v2144_v28 = vpop.xlane.xlu0 %2143 }
 0xa21   : > { %v2145_v29 = vmul.f32 0.03125, %v2144_v28  ;;  %v2196_v28 = vld [vmem:[#allocation2 + $0x250] sm:$0xff] }
 0xa23   : > { %v2146_v30 = vsub.f32 %v2141_v25, %v2145_v29  ;;  %v4382_v25 = vpack.c.bf16 %v2184_v16, %v2172_v15 }
 0xa25   : > { %v2147_v33 = vmul.f32 %v2146_v30, %v2146_v30 }
 0xa27   : > { %v2148_v36 = vsel %vm615_vm0, %v2147_v33, 0.0  ;;  %v4384_v33 = vpack.c.bf16 %v2209_v21, %v2197_v20 }
 0xa28   : > { %2149 = vadd.xlane.f32.xlu0 %v2148_v36  ;;  %v4408_v36 = vpack.c.bf16 %v2215_v23, %v2203_v22  ;;  %v2283_v22 = vrot.slane %v3978_v6, %v745_v38  ;;  %v3979_v23 = vld [vmem:[%s5348_s4 + $0x14] sm:$0xf] }
 0xa29   : > { %v2295_v41 = vrot.slane %v3979_v23, %v4901_v35  ;;  %v2303_v46 = vrot.slane %v3979_v23, %v4914_v43 }
 0xab5   : > { %v2150_v9 = vpop.xlane.xlu0 %2149 }
 0xab6   : > { %v2151_v10 = vmul.f32 0.03125, %v2150_v9  ;;  %v2279_v9 = vrot.slane %v3978_v6, %v741_v32 }
 0xab8   : > { %v2152_v11 = vadd.f32 1e-12, %v2151_v10  ;;  %v2259_v10 = vrot.slane %v3978_v6, %v4898_v34 }
 0xaba   : > { %4536 = vrsqrt.f32 %v2152_v11 }
 0xac4   : > { %v4537_v13 = vpop.eup %4536 }
 0xac5   : > { %v2154_v17 = vmul.f32 %v4537_v13, %v2146_v30  ;;  %v4386_v30 = vpack.c.bf16 %v2208_v39, %v2196_v28  ;;  %v2291_v28 = vrot.slane %v3979_v23, %v4898_v34  ;;  %v2299_v34 = vrot.slane %v3979_v23, %v4911_v42 }
 0xac7   : > { %v2161_v24 = vmul.f32 %v3976_v12, %v2154_v17 }
 0xac9   : > { %v5073_v29 = vadd.f32 %v3977_v14, %v2161_v24  ;;  %v2263_v14 = vrot.slane %v3978_v6, %v4901_v35  ;;  %v2287_v24 = vrot.slane %v3978_v6, %v749_v40 }
 0xacb   : > { %4003 = vmatmul.mubr.msk.f32.vlgmr.msra.gmra.mrb[16].mxu1 %vm615_vm0, %v5073_v29  ;;  %4005 = vmatmul.mubr.msk.f32.vlgmr.msra.gmra.mrb[18].mxu0 %vm615_vm0, %v5073_v29 }
 0xacc   : > { %4383 = vmatpush1.bf16.msra.mxu1 %v4382_v25  ;;  %4407 = vmatpush1.bf16.msra.mxu0 %v4406_v27  ;;  %v2267_v25 = vrot.slane %v3978_v6, %v4911_v42 }
 0xacd   : > { %4385 = vmatprep.subr.bf16.mxu1 %v4384_v33  ;;  %4409 = vmatprep.subr.bf16.mxu0 %v4408_v36  ;;  %v2271_v33 = vrot.slane %v3978_v6, %v4914_v43 }
 0xace   : > { %2454 = vmatprep.mubr.f32.mxu1 %v4661_v37  ;;  %2667 = vmatprep.mubr.f32.mxu0 %v4661_v37 }
 0xad0   : > { %4387 = vmatpush1.bf16.msra.mxu1 %v4386_v30  ;;  %4411 = vmatpush1.bf16.msra.mxu0 %v4410_v47 }
 0xad1   : > { %4397 = vmatprep.subr.bf16.mxu1 %v4396_v48  ;;  %4197 = vmatprep.subr.mxu0 %v4661_v37 }
 0xad3   : > { %4004 = vmatmul.mubr.msk.f32.vlgmr.msra.gmra.mrb[18].mxu1 %vm615_vm0, %v5073_v29  ;;  %4007 = vmatmul.mubr.msk.f32.vlgmr.msra.gmra.mrb[20].mxu0 %vm615_vm0, %v5073_v29 }
 0xad4   : > { %4399 = vmatpush1.bf16.msra.mxu1 %v4398_v52  ;;  %2596 = vmatprep.mubr.f32.mxu1 %v4661_v37 }
 0xad5   : > { %4401 = vmatprep.subr.bf16.mxu1 %v4400_v53  ;;  %4199 = vmatprep.mubr.msk.f32.mxu0 %vm4662_vm1, %v4661_v37 }
 0xad8   : > { %4403 = vmatpush1.bf16.msra.mxu1 %v4402_v59 }
 0xad9   : > { %4413 = vmatprep.subr.bf16.mxu1 %v4412_v60 }
 0xadb   : > { %4006 = vmatmul.mubr.msk.f32.vlgmr.msra.gmra.mrb[20].mxu1 %vm615_vm0, %v5073_v29 }
 0xadc   : > { %4415 = vmatpush1.bf16.msra.mxu1 %v4414_v1  ;;  %2738 = vmatprep.mubr.f32.mxu1 %v4661_v37 }
 0xadd   : > { %4417 = vmatprep.subr.bf16.mxu1 %v4416_v2 }
 0xae0   : > { %4419 = vmatpush1.bf16.msra.mxu1 %v4418_v5 }
 0xae1   : > { %4202 = vmatprep.subr.mxu1 %v4661_v37 }
 0xae3   : > { %4008 = vmatmul.mubr.msk.f32.vlgmr.msra.gmra.mrb[22].mxu1 %vm615_vm0, %v5073_v29 }
 0xae4   : > { %4204 = vmatprep.mubr.msk.f32.mxu1 %vm4662_vm1, %v4661_v37 }
 0xb9e   : > { %v2385_v11 = vpop.f32.mrb[16].mxu1  ;;  %v2527_v12 = vpop.f32.mrb[18].mxu0 }
 0xb9f   : > { %v2528_v13 = vadd.f32 %v2527_v12, %v2275_v7  ;;  %v2387_v15 = vpop.f32.mrb[17].mxu1  ;;  %v2529_v16 = vpop.f32.mrb[19].mxu0  ;;  %v2386_v18 = vadd.f32 %v2385_v11, %v2259_v10 }
 0xba0   : > { %v2530_v17 = vadd.f32 %v2529_v16, %v2279_v9  ;;  %v2388_v31 = vadd.f32 %v2387_v15, %v2263_v14 }
 0xba1   : > { %4198 = vmatpush3.xpose.msk.msra.mxu0 %vm1208_vm2, %v2528_v13 }
 0xba2   : > { %4203 = vmatpush3.xpose.msk.msra.mxu1 %vm1208_vm2, %v2530_v17  ;;  %4207 = vmatprep.subr.mxu0 %v4661_v37 }
 0xba3   : > { %4212 = vmatprep.subr.mxu1 %v4661_v37 }
 0xba4   : > { %4200 = vmatmul.mubr.msk.f32.vlgmr.msra.gmra.mrb[22].mxu0 %vm1208_vm2, %v2386_v18 }
 0xba5   : > { %4205 = vmatmul.mubr.msk.f32.vlgmr.msra.gmra.mrb[24].mxu1 %vm1208_vm2, %v2388_v31  ;;  %4209 = vmatprep.mubr.msk.f32.mxu0 %vm4662_vm1, %v4661_v37 }
 0xba6   : > { %v2456_v32 = vpop.f32.mrb[18].mxu1  ;;  %v2669_v19 = vpop.f32.mrb[20].mxu0  ;;  %4214 = vmatprep.mubr.msk.f32.mxu1 %vm4662_vm1, %v4661_v37 }
 0xba7   : > { %v2458_v20 = vpop.f32.mrb[19].mxu1  ;;  %v2671_v21 = vpop.f32.mrb[21].mxu0  ;;  %v2457_v38 = vadd.f32 %v2456_v32, %v2267_v25  ;;  %v2670_v26 = vadd.f32 %v2669_v19, %v2291_v28 }
 0xba8   : > { %v2459_v40 = vadd.f32 %v2458_v20, %v2271_v33  ;;  %v2672_v45 = vadd.f32 %v2671_v21, %v2295_v41  ;;  %v3981_v41 = vld [vmem:[%s5349_s5 + $0x28] sm:$0xff] }
 0xbae   : > { %v2598_v27 = vpop.f32.mrb[20].mxu1 }
 0xbaf   : > { %v2599_v36 = vadd.f32 %v2598_v27, %v2283_v22  ;;  %v2600_v39 = vpop.f32.mrb[21].mxu1 }
 0xbb0   : > { %v2601_v44 = vadd.f32 %v2600_v39, %v2287_v24  ;;  %v3980_v39 = vld [vmem:[%s5349_s5 + $0x20] sm:$0xff] }
 0xbb1   : > { %4208 = vmatpush3.xpose.msk.msra.mxu0 %vm1208_vm2, %v2599_v36 }
 0xbb2   : > { %4213 = vmatpush3.xpose.msk.msra.mxu1 %vm1208_vm2, %v2601_v44  ;;  %4217 = vmatprep.subr.mxu0 %v4661_v37  ;;  %v3982_v44 = vld [vmem:[%s5349_s5 + $0x30] sm:$0xff] }
 0xbb3   : > { %4222 = vmatprep.subr.mxu1 %v4661_v37 }
 0xbb4   : > { %4210 = vmatmul.mubr.msk.f32.vlgmr.msra.gmra.mrb[24].mxu0 %vm1208_vm2, %v2457_v38  ;;  %v4421_v38 = vpack.c.bf16 %v3981_v41, %v3980_v39 }
 0xbb5   : > { %4215 = vmatmul.mubr.msk.f32.vlgmr.msra.gmra.mrb[26].mxu1 %vm1208_vm2, %v2459_v40  ;;  %4218 = vmatpush3.msra.mxu0 %v2670_v26  ;;  %v3983_v26 = vld [vmem:[%s5349_s5 + $0x38] sm:$0xff] }
 0xbb6   : > { %v2740_v35 = vpop.f32.mrb[22].mxu1  ;;  %4223 = vmatpush3.msra.mxu1 %v2672_v45  ;;  %4219 = vmatprep.mubr.msk.f32.mxu0 %vm4662_vm1, %v4661_v37  ;;  %v4424_v40 = vpack.c.bf16 %v3983_v26, %v3982_v44 }
 0xbb7   : > { %v5137_v30 = vadd.f32 %v2740_v35, %v2299_v34  ;;  %v2742_v47 = vpop.f32.mrb[23].mxu1  ;;  %4227 = vmatprep.subr.mxu0 %v4661_v37  ;;  %4224 = vmatprep.mubr.msk.f32.mxu1 %vm4662_vm1, %v4661_v37 }
 0xbb8   : > { %v2743_v42 = vadd.f32 %v2742_v47, %v2303_v46  ;;  %4232 = vmatprep.subr.mxu1 %v4661_v37 }
 0xc77   : > { %v2817_v43 = vpop.f32.mrb[22].mxu0 }
 0xc78   : > { %v3049_v48 = vmul.f32 0.35355338, %v2817_v43  ;;  %v4201_v49 = vpop.f32.mrb[23].mxu0  ;;  %v2893_v50 = vpop.f32.mrb[24].mxu1 }
 0xc79   : > { %v3050_v58 = vmul.f32 0.35355338, %v2893_v50  ;;  %v4206_v51 = vpop.f32.mrb[25].mxu1 }
 0xc7a   : > { %v3053_v52 = vsel %vm1208_vm2, %v3049_v48, -inf }
 0xc7b   : > { %3054 = vmax.xlane.f32.xlu1 %v3053_v52  ;;  %v3056_v53 = vsel %vm1208_vm2, %v3050_v58, -inf }
 0xc7c   : > { %3057 = vmax.xlane.f32.xlu0 %v3056_v53  ;;  %v4021_v53 = vld [vmem:[%s5350_s6 + $0x1] ss:$0 sm:$0xff] }
 0xc87   : > { %v2969_v54 = vpop.f32.mrb[24].mxu0 }
 0xc88   : > { %v3051_v55 = vmul.f32 0.35355338, %v2969_v54  ;;  %v4211_v56 = vpop.f32.mrb[25].mxu0  ;;  %v3045_v57 = vpop.f32.mrb[26].mxu1 }
 0xc89   : > { %v3052_v59 = vmul.f32 0.35355338, %v3045_v57  ;;  %v4216_v60 = vpop.f32.mrb[27].mxu1 }
 0xc8a   : > { %v3059_v61 = vsel %vm1208_vm2, %v3051_v55, -inf }
 0xc8b   : > { %3060 = vmax.xlane.f32.xlu1 %v3059_v61  ;;  %v3062_v62 = vsel %vm1208_vm2, %v3052_v59, -inf }
 0xc8c   : > { %3063 = vmax.xlane.f32.xlu0 %v3062_v62 }
 0xd08   : > { %v3055_v63 = vpop.xlane.xlu1 %3054 }
 0xd09   : > { %v3065_v0 = vsub.f32 %v3049_v48, %v3055_v63  ;;  %v3058_v1 = vpop.xlane.xlu0 %3057 }
 0xd0a   : > { %v3066_v2 = vsub.f32 %v3050_v58, %v3058_v1  ;;  %v3987_v1 = vld [vmem:[%s5353_s9 + $0x20] sm:$0xff] }
 0xd0b   : > { %v3069_v3 = vmul.f32 1.442695, %v3065_v0 }
 0xd0c   : > { %v3071_v4 = vmul.f32 1.442695, %v3066_v2  ;;  %v3988_v2 = vld [vmem:[%s5353_s9 + $0x28] sm:$0xff] }
 0xd0d   : > { %4538 = vpow2.f32 %v3069_v3  ;;  %v4427_v3 = vpack.c.bf16 %v3988_v2, %v3987_v1  ;;  %v3781_v1 = vld [vmem:[%s5361_s17] sm:$0xff]  ;;  %v3782_v2 = vld [vmem:[%s5361_s17 + $0x8] sm:$0xff] }
 0xd0e   : > { %4540 = vpow2.f32 %v3071_v4  ;;  %v3990_v4 = vld [vmem:[%s5353_s9 + $0x38] sm:$0xff] }
 0xd17   : > { %v4539_v5 = vpop.eup %4538 }
 0xd18   : > { %v4541_v6 = vpop.eup %4540  ;;  %v3061_v7 = vpop.xlane.xlu1 %3060  ;;  %v3077_v9 = vsel %vm1208_vm2, %v4539_v5, 0.0 }
 0xd19   : > { %v3067_v10 = vsub.f32 %v3051_v55, %v3061_v7  ;;  %v3064_v11 = vpop.xlane.xlu0 %3063  ;;  %3078 = vadd.xlane.f32.xlu1 %v3077_v9  ;;  %v3080_v12 = vsel %vm1208_vm2, %v4541_v6, 0.0 }
 0xd1a   : > { %v3068_v13 = vsub.f32 %v3052_v59, %v3064_v11  ;;  %3081 = vadd.xlane.f32.xlu0 %v3080_v12  ;;  %v4023_v11 = vld [vmem:[%s5351_s7 + $0x1] ss:$0 sm:$0xff] }
 0xd1b   : > { %v3073_v14 = vmul.f32 1.442695, %v3067_v10 }
 0xd1c   : > { %v3075_v15 = vmul.f32 1.442695, %v3068_v13  ;;  %v4024_v13 = vld [vmem:[%s5352_s8 + $0x1] ss:$0 sm:$0xff] }
 0xd1d   : > { %4542 = vpow2.f32 %v3073_v14 }
 0xd1e   : > { %4544 = vpow2.f32 %v3075_v15 }
 0xd27   : > { %v4543_v16 = vpop.eup %4542 }
 0xd28   : > { %v4545_v17 = vpop.eup %4544  ;;  %v3083_v18 = vsel %vm1208_vm2, %v4543_v16, 0.0 }
 0xd29   : > { %3084 = vadd.xlane.f32.xlu1 %v3083_v18  ;;  %v3086_v31 = vsel %vm1208_vm2, %v4545_v17, 0.0 }
 0xd2a   : > { %3087 = vadd.xlane.f32.xlu0 %v3086_v31  ;;  %v3994_v31 = vld [vmem:[%s5355_s11 + $0x50] sm:$0xff] }
 0xda6   : > { %v3079_v32 = vpop.xlane.xlu1 %3078 }
 0xda7   : > { %4546 = vrcp.f32 %v3079_v32  ;;  %v3082_v19 = vpop.xlane.xlu0 %3081  ;;  %v3995_v32 = vld [vmem:[%s5355_s11 + $0x58] sm:$0xff] }
 0xda8   : > { %4548 = vrcp.f32 %v3082_v19  ;;  %v4436_v19 = vpack.c.bf16 %v3995_v32, %v3994_v31 }
 0xdb1   : > { %v4547_v20 = vpop.eup %4546 }
 0xdb2   : > { %v4549_v21 = vpop.eup %4548  ;;  %v3093_v22 = vmul.f32 %v4547_v20, %v4539_v5  ;;  %v3996_v20 = vld [vmem:[%s5355_s11 + $0x60] sm:$0xff] }
 0xdb3   : > { %v3094_v23 = vmul.f32 %v4549_v21, %v4541_v6  ;;  %v3997_v21 = vld [vmem:[%s5355_s11 + $0x68] sm:$0xff] }
 0xdb4   : > { %4220 = vmatmul.mubr.msk.f32.vlgmr.msra.gmra.mrb[26].mxu0 %vm1208_vm2, %v3093_v22  ;;  %v4439_v22 = vpack.c.bf16 %v3997_v21, %v3996_v20 }
 0xdb5   : > { %4228 = vmatpush3.msra.mxu0 %v5137_v30  ;;  %4225 = vmatmul.mubr.msk.f32.vlgmr.msra.gmra.mrb[28].mxu1 %vm1208_vm2, %v3094_v23  ;;  %v3998_v23 = vld [vmem:[%s5355_s11 + $0x70] sm:$0xff] }
 0xdb6   : > { %4233 = vmatpush3.msra.mxu1 %v2743_v42  ;;  %v3085_v24 = vpop.xlane.xlu1 %3084  ;;  %4229 = vmatprep.mubr.msk.f32.mxu0 %vm4662_vm1, %v4661_v37 }
 0xdb7   : > { %4550 = vrcp.f32 %v3085_v24  ;;  %v3088_v25 = vpop.xlane.xlu0 %3087  ;;  %4234 = vmatprep.mubr.msk.f32.mxu1 %vm4662_vm1, %v4661_v37  ;;  %4420 = vmatprep.subr.bf16.mxu0 %v4663_v8  ;;  %v3999_v24 = vld [vmem:[%s5355_s11 + $0x78] sm:$0xff] }
 0xdb8   : > { %4552 = vrcp.f32 %v3088_v25  ;;  %4426 = vmatprep.subr.bf16.mxu1 %v4663_v8  ;;  %v4442_v25 = vpack.c.bf16 %v3999_v24, %v3998_v23 }
 0xdc1   : > { %v4551_v27 = vpop.eup %4550 }
 0xdc2   : > { %v4553_v28 = vpop.eup %4552  ;;  %v3095_v33 = vmul.f32 %v4551_v27, %v4543_v16  ;;  %v3992_v16 = vld [vmem:[%s5355_s11 + $0x40] sm:$0xff] }
 0xdc3   : > { %v3096_v36 = vmul.f32 %v4553_v28, %v4545_v17  ;;  %v3993_v17 = vld [vmem:[%s5355_s11 + $0x48] sm:$0xff]  ;;  %v4025_v27 = vld [vmem:[%s5354_s10 + $0x1] ss:$0 sm:$0xff] }
 0xdc4   : > { %4230 = vmatmul.mubr.msk.f32.vlgmr.msra.gmra.mrb[28].mxu0 %vm1208_vm2, %v3095_v33  ;;  %v4433_v18 = vpack.c.bf16 %v3993_v17, %v3992_v16 }
 0xdc5   : > { %4235 = vmatmul.mubr.msk.f32.vlgmr.msra.gmra.mrb[30].mxu1 %vm1208_vm2, %v3096_v36  ;;  %4245 = vmatprep.mubr.msk.f32.mxu0 %vm4662_vm1, %v4661_v37 }
 0xdc6   : > { %4256 = vmatprep.mubr.msk.f32.mxu1 %vm4662_vm1, %v4661_v37  ;;  %4422 = vmatpush3.bf16.msra.mxu0 %v4421_v38 }
 0xdc7   : > { %4423 = vmatprep.subr.bf16.mxu0 %v4663_v8  ;;  %4428 = vmatpush3.bf16.msra.mxu1 %v4427_v3  ;;  %v3783_v3 = vld [vmem:[%s5361_s17 + $0x10] sm:$0xff] }
 0xdc8   : > { %4429 = vmatprep.subr.bf16.mxu1 %v4663_v8 }
 0xdca   : > { %4425 = vmatpush3.bf16.msra.mxu0 %v4424_v40  ;;  %v4027_v40 = vld [vmem:[%s5356_s12 + $0x1] ss:$0 sm:$0xff] }
 0xdcb   : > { %4432 = vmatprep.subr.bf16.mxu0 %v4663_v8 }
 0xe87   : > { %v3166_v34 = vpop.f32.mrb[26].mxu0 }
 0xe88   : > { %v4221_v45 = vpop.f32.mrb[27].mxu0  ;;  %v3239_v46 = vpop.f32.mrb[28].mxu1 }
 0xe89   : > { %v4226_v35 = vpop.f32.mrb[29].mxu1  ;;  %3390 = vrot.lane.b32.xlu1 %v3239_v46, %s4664_s24  ;;  %s607_s24 = scalar_lea.vmem [#allocation5], %s606_s22 }
 0xe97   : > { %v3312_v30 = vpop.f32.mrb[28].mxu0 }
 0xe98   : > { %v3385_v47 = vpop.f32.mrb[30].mxu1  ;;  %3394 = vrot.lane.b32.xlu0 %v3312_v30, %s4665_s0  ;;  %v4231_v42 = vpop.f32.mrb[29].mxu0  ;;  %s3874_s0 = sshll.u32 %s607_s24, 4  ;;  %s5304_s0 = int_to_ptr.vmem [resolvable:$true] %s3874_s0 }
 0xe99   : > { %v4236_v43 = vpop.f32.mrb[31].mxu1  ;;  %3398 = vrot.lane.b32.xlu1 %v3385_v47, %s4666_s20  ;;  %s4590_s21 = scalar_lea.vmem %s5304_s0, 16  ;;  %p4597_p2 = scmp.lt.s32.totalorder %s5304_s0, %s4595_s28 }
 0xe9a   : > { %p4591_p6 = scmp.ne.s32.totalorder %s5304_s0, %s4590_s21  ;;  %p4598_p3 = scmp.lt.s32.totalorder %s4596_s19, %s4590_s21 }
 0xe9c   : > { %p4592_p10 = pnand %p4591_p6, %p5398_p9  ;;  %p4599_p4 = por %p4598_p3, %p4597_p2 }
 0xe9e   : > { %p4593_p12 = pneg %p4592_p10 }
 0xea0   : > { %p4600_p7 = pnand %p4599_p4, %p4593_p12 }
 0xefb   : > { %v3391_v48 = vpop.permute.xlu1 %3390 }
 0xefc   : > { %v3401_v49 = vsel %vm1208_vm2, %v3166_v34, %v3391_v48 }
 0xf0a   : > { %v3395_v50 = vpop.permute.xlu0 %3394 }
 0xf0b   : > { %v3402_v58 = vsel %vm1866_vm3, %v3401_v49, %v3395_v50  ;;  %v3399_v51 = vpop.permute.xlu1 %3398  ;;  %v3702_v50 = vld [vmem:[%s5359_s15] sm:$0xff] }
 0xf0c   : > { %v3403_v52 = vsel %vm1868_vm4, %v3402_v58, %v3399_v51  ;;  %v3703_v58 = vld [vmem:[%s5359_s15 + $0x8] sm:$0xff] }
 0xf0d   : > { %4246 = vmatmul.mubr.msk.f32.vlgmr.msra.gmra.mrb[30].mxu0 %vm615_vm0, %v3403_v52  ;;  %v4445_v51 = vpack.c.bf16 %v3703_v58, %v3702_v50  ;;  %v3704_v52 = vld [vmem:[%s5359_s15 + $0x10] sm:$0xff] }
 0xf0e   : > { %4275 = vmatprep.mubr.msk.f32.mxu0 %vm4662_vm1, %v4661_v37  ;;  %4434 = vmatpush3.bf16.msra.mxu0 %v4433_v18 }
 0xf0f   : > { %4435 = vmatprep.subr.bf16.mxu0 %v4663_v8 }
 0xf12   : > { %4437 = vmatpush3.bf16.msra.mxu0 %v4436_v19 }
 0xf13   : > { %4438 = vmatprep.subr.bf16.mxu0 %v4663_v8 }
 0xf16   : > { %4440 = vmatpush3.bf16.msra.mxu0 %v4439_v22 }
 0xf17   : > { %4441 = vmatprep.subr.bf16.mxu0 %v4663_v8 }
 0xf1a   : > { %4443 = vmatpush3.bf16.msra.mxu0 %v4442_v25 }
 0xfe0   : > { %v3479_v54 = vpop.f32.mrb[30].mxu0 }
 0xfe1   : > { %v3480_v55 = vadd.f32 %v4021_v53, %v3479_v54  ;;  %v4247_v56 = vpop.f32.mrb[31].mxu0  ;;  %v3705_v53 = vld [vmem:[%s5359_s15 + $0x18] sm:$0xff] }
 0xfe2   : > { %v4448_v54 = vpack.c.bf16 %v3705_v53, %v3704_v52 }
 0xfe3   : > { %v3483_v57 = vadd.f32 %v3480_v55, %v5073_v29  ;;  %v3989_v29 = vld [vmem:[%s5353_s9 + $0x30] sm:$0xff] }
 0xfe4   : > { %v4430_v5 = vpack.c.bf16 %v3990_v4, %v3989_v29  ;;  %v4451_v29 = vpack.c.bf16 %v3782_v2, %v3781_v1  ;;  %v3784_v4 = vld [vmem:[%s5361_s17 + $0x18] sm:$0xff] }
 0xfe5   : > { %v3484_v59 = vsel %vm615_vm0, %v3483_v57, 0.0 }
 0xfe6   : > { %3485 = vadd.xlane.f32.xlu1 %v3484_v59  ;;  %4431 = vmatpush3.bf16.msra.mxu1 %v4430_v5  ;;  %v3706_v5 = vld [vmem:[%s5360_s16] sm:$0x1] }
 0xfe7   : > { %4444 = vmatprep.subr.bf16.mxu1 %v4663_v8 }
0x1073   : > { %v3486_v60 = vpop.xlane.xlu1 %3485 }
0x1074   : > { %v3487_v61 = vmul.f32 0.03125, %v3486_v60  ;;  %v4029_v60 = vld [vmem:[%s5357_s13 + $0x1] ss:$0 sm:$0xff] }
0x1076   : > { %v3488_v62 = vsub.f32 %v3483_v57, %v3487_v61 }
0x1078   : > { %v3489_v63 = vmul.f32 %v3488_v62, %v3488_v62 }
0x107a   : > { %v3490_v0 = vsel %vm615_vm0, %v3489_v63, 0.0 }
0x107b   : > { %3491 = vadd.xlane.f32.xlu0 %v3490_v0 }
0x1108   : > { %v3492_v6 = vpop.xlane.xlu0 %3491 }
0x1109   : > { %v3493_v7 = vmul.f32 0.03125, %v3492_v6 }
0x110b   : > { %v3494_v9 = vadd.f32 1e-12, %v3493_v7 }
0x110d   : > { %4554 = vrsqrt.f32 %v3494_v9 }
0x1117   : > { %v4555_v10 = vpop.eup %4554 }
0x1118   : > { %v3496_v12 = vmul.f32 %v4555_v10, %v3488_v62  ;;  %v4030_v62 = vld [vmem:[%s5358_s14 + $0x1] ss:$0 sm:$0xff] }
0x111a   : > { %v3503_v14 = vmul.f32 %v4023_v11, %v3496_v12  ;;  %v3785_v11 = vld [vmem:[%s5362_s18] sm:$0x1] }
0x111c   : > { %v3510_v15 = vadd.f32 %v4024_v13, %v3503_v14 }
0x111e   : > { %4257 = vmatmul.mubr.msk.f32.vlgmr.msra.gmra.mrb[32].mxu1 %vm615_vm0, %v3510_v15 }
0x111f   : > { %4286 = vmatprep.mubr.msk.f32.mxu1 %vm4662_vm1, %v4661_v37  ;;  %4446 = vmatpush3.bf16.msra.mxu1 %v4445_v51 }
0x1120   : > { %4447 = vmatprep.subr.bf16.mxu1 %v4663_v8 }
0x1123   : > { %4449 = vmatpush3.bf16.msra.mxu1 %v4448_v54 }
0x1124   : > { %4450 = vmatprep.subr.bf16.mxu1 %v4663_v8 }
0x11f1   : > { %v3586_v28 = vpop.f32.mrb[32].mxu1 }
0x11f2   : > { %v3587_v33 = vadd.f32 %v4025_v27, %v3586_v28  ;;  %v4258_v36 = vpop.f32.mrb[33].mxu1 }
0x11f4   : > { %v3591_v39 = vmul.f32 0.70710677, %v3587_v33  ;;  %v3590_v44 = vmul.f32 0.5, %v3587_v33 }
0x11f6   : > { %4556 = verf.f32 %v3591_v39 }
0x1200   : > { %v4557_v41 = vpop.eup %4556 }
0x1201   : > { %v3593_v38 = vadd.f32 1.0, %v4557_v41 }
0x1203   : > { %v3594_v26 = vmul.f32 %v3593_v38, %v3590_v44 }
0x1205   : > { %4276 = vmatmul.mubr.msk.f32.vlgmr.msra.gmra.mrb[32].mxu0 %vm2067_vm5, %v3594_v26 }
0x12d8   : > { %v3670_v34 = vpop.f32.mrb[32].mxu0 }
0x12d9   : > { %v3671_v45 = vadd.f32 %v4027_v40, %v3670_v34  ;;  %v4277_v46 = vpop.f32.mrb[33].mxu0 }
0x12db   : > { %v3674_v35 = vadd.f32 %v3671_v45, %v3510_v15 }
0x12dd   : > { %v3675_v30 = vsel %vm615_vm0, %v3674_v35, 0.0 }
0x12de   : > { %3676 = vadd.xlane.f32.xlu0 %v3675_v30 }
0x136b   : > { %v3677_v47 = vpop.xlane.xlu0 %3676 }
0x136c   : > { %v3678_v42 = vmul.f32 0.03125, %v3677_v47 }
0x136e   : > { %v3679_v43 = vsub.f32 %v3674_v35, %v3678_v42 }
0x1370   : > { %v3680_v48 = vmul.f32 %v3679_v43, %v3679_v43 }
0x1372   : > { %v3681_v49 = vsel %vm615_vm0, %v3680_v48, 0.0 }
0x1373   : > { %3682 = vadd.xlane.f32.xlu1 %v3681_v49 }
0x1400   : > { %v3683_v55 = vpop.xlane.xlu1 %3682 }
0x1401   : > { %v3684_v56 = vmul.f32 0.03125, %v3683_v55 }
0x1403   : > { %v3685_v57 = vadd.f32 1e-12, %v3684_v56 }
0x1405   : > { %4558 = vrsqrt.f32 %v3685_v57 }
0x140f   : > { %v4559_v59 = vpop.eup %4558 }
0x1410   : > { %v3687_v61 = vmul.f32 %v4559_v59, %v3679_v43 }
0x1412   : > { %v3694_v63 = vmul.f32 %v4029_v60, %v3687_v61 }
0x1414   : > { %v3701_v0 = vadd.f32 %v4030_v62, %v3694_v63 }
0x1416   : > { %4287 = vmatmul.mubr.msk.f32.vlgmr.msra.gmra.mrb[34].mxu1 %vm615_vm0, %v3701_v0 }
0x1417   : > { %4297 = vmatprep.mubr.msk.f32.mxu1 %vm4662_vm1, %v4661_v37  ;;  %4452 = vmatpush3.bf16.msra.mxu1 %v4451_v29  ;;  %v4454_v37 = vpack.c.bf16 %v3784_v4, %v3783_v3 }
0x1418   : > { %4453 = vmatprep.subr.bf16.mxu1 %v4663_v8 }
0x141b   : > { %4455 = vmatpush3.bf16.msra.mxu1 %v4454_v37 }
0x14e9   : > { %v3776_v6 = vpop.f32.mrb[34].mxu1 }
0x14ea   : > { %v3777_v7 = vadd.f32 %v3776_v6, %v3706_v5  ;;  %v4288_v9 = vpop.f32.mrb[35].mxu1 }
0x14ec   : > { %4560 = vtanh.f32 %v3777_v7 }
0x14f6   : > { %v4561_v10 = vpop.eup %4560 }
0x14f7   : > { %4298 = vmatmul.mubr.msk.f32.vlgmr.msra.gmra.mrb[36].mxu1 %vm615_vm0, %v4561_v10 }
0x15ca   : > { %v3855_v8 = vpop.f32.mrb[36].mxu1 }
0x15cb   : > { %v3856_v12 = vadd.f32 %v3855_v8, %v3785_v11  ;;  %v4299_v13 = vpop.f32.mrb[37].mxu1 }
0x15cd   : > { %3860 = vst.msk [vmem:[%s607_s24] sm:$0x1] %vm3859_vm6, %v3856_v12 }
0x15ce   : > { %4603 = shalt.err (!%p4600_p7)
}
0x15cf   : > { %s4604_s22 = scalar_lea.hbm %s5302_s26, 16  ;;  %s4608_s20 = scalar_lea.hbm %s5397_s2, 32 }
0x15d0   : > { %p4605_p8 = scmp.ne.s32.totalorder %s5302_s26, %s4604_s22  ;;  %p4609_p1 = scmp.lt.u32.totalorder %s5302_s26, %s5397_s2 }
0x15d1   : > { %p4610_p0 = scmp.lt.u32.totalorder %s4608_s20, %s4604_s22  ;;  %p4612_p6 = scmp.lt.u32.totalorder %s4604_s22, %s5302_s26 }
0x15d2   : > { %p4606_p11 = pnand %p4605_p8, %p5398_p9 }
0x15d3   : > { %p4611_p5 = por %p4610_p0, %p4609_p1 }
0x15d4   : > { %p4607_p13 = pneg %p4606_p11 }
0x15d5   : > { %p4613_p10 = por %p4612_p6, %p4611_p5 }
0x15d7   : > { %p4614_p12 = pnand %p4613_p10, %p4607_p13 }
0x15d9   : > { %4617 = shalt.err (!%p4614_p12)
}
0x15da   : > { %4460 = dma.vmem_to_hbm [thread:$0]  (%p5398_p9), %s5304_s0, 16, %s5302_s26, %s3862_s23  }
0x15db PF: > { %s5399_s21 = sld [smem:[#allocation10_spill]]  ;;  %s5400_s28 = sld [smem:[#allocation8_spill]] }
0x15dc   : > { %s5401_s19 = sld [smem:[#allocation13_spill]] }
0x15e1   : > { %p4472_p2 = scmp.ge.s32.totalorder %s5399_s21, 2  ;;  %s3886_s27 = sand.u32 1, %s5400_s28  }
0x15e2   : > { %p5402_p3 = scmp.ne.s32.totalorder %s5401_s19, 0  ;;  %s3887_s24 = scalar_lea.sflag [#allocation4], %s3886_s27 }
0x15e4   : > { %p4467_p4 = pnand %p4472_p2, %p5402_p3 }
0x15e6   : > { %4639 = dma.done.wait (!%p4467_p4), %s3887_s24, 16  }
0x15e7   : > { %4641 = vsyncadd (!%p4467_p4), %s3887_s24, 4294967280  ;;  %s5403_s21 = sld [smem:[#allocation11_spill]]  ;;  %s5404_s22 = sld [smem:[#allocation9_spill]] }
0x15e8   : > { %s5405_s20 = sld [smem:[#allocation12_spill]]  ;;  %s5406_s0 = smov %s4648_s30 }
0x15ed   : > { %p30_p7 = scmp.ge.s32.totalorder %s5403_s21, 4   ;;  %s5407_s30 = smov %s5404_s22 }
0x15ef   :  { %32 = sbr.rel (!%p30_p7) target bundleno = 10 (0xa), region = 148 }
0x15f6   :  { %3891 = vsyncpa [#allocation3], 1 }
0x15f7   :  { %3893 = vsyncpa [#allocation3 + $0x1], 1 }
0x15f8   :  { %3894 = vsyncpa [#allocation4], 1 }
0x15f9   :  { %3896 = vsyncpa [#allocation4 + $0x1], 1 }

</bundles_post_ra>
